<compile_context>
chip_gen: v5e
topology: v5e:2x2
jax: 0.10.0
libtpu: 0.0.40
codegen_flags: <defaults>
</compile_context>

<pallas_src>
import functools

import jax
import jax.numpy as jnp
from jax.experimental import pallas as pl
from jax.experimental.pallas import tpu as pltpu

DILATIONS = (1, 2, 3)          # is_dilated=True -> temporal kernel size 3, dilations 1/2/3
N_BRANCHES = 5
EXPANSION_FACTOR = 1.25
BN_EPS = 1e-5
MAXD = 3                       # max temporal dilation -> zero-border width


def _vmem_limit_bytes():
    # Generation-aware VMEM request: ~7/8 of physical, capped.
    # v7x (64 MiB) -> 56 MiB; v5e/v6e (128 MiB) -> 112 MiB; unknown -> 56 MiB.
    try:
        cap = int(pltpu.get_tpu_info().vmem_capacity_bytes)
    except Exception:
        cap = 64 * 1024 * 1024
    return min((cap * 7) // 8, 112 * 1024 * 1024)


# ----------------------------------------------------------------------------
# Timeception grouped temporal-conv block: one grid step per (group, sample).
# ----------------------------------------------------------------------------
def _tc_branches(x_ref, w_ref, b_ref, taps_ref, dwb_ref, bn5_ref, pbuf):
    """Shared per-(group,sample) body. Returns f32 slabs (branch1, branches2-4, branch5).

    x_ref   : (1, 1, T, HW, Cg)  bf16   input activations of this group/sample
    w_ref   : (1, Cg, 5*Cb)      bf16   fused pointwise weights (branch-major, b1 BN folded)
    b_ref   : (1, 1, 5*Cb)       f32    fused pointwise bias (b1 BN folded)
    taps_ref: (1, 7, 3*Cb)       f32    temporal taps (shifts -3..+3) for branches 2-4 (BN folded)
    dwb_ref : (1, 1, 3*Cb)       f32    depthwise bias (+BN shift) for branches 2-4
    bn5_ref : (1, 2, Cb)         f32    branch-5 BN scale/shift (applied AFTER the pool)
    pbuf    : VMEM (T+2*MAXD, HW, 3*Cb) f32 scratch (zero border rows + P mid slice)
    """
    X = x_ref[0, 0]                                   # (T, HW, Cg) bf16
    T, HW, Cg = X.shape
    W = w_ref[0]                                      # (Cg, C5) bf16
    C5 = W.shape[-1]
    Cb = C5 // N_BRANCHES
    W3 = 3 * Cb

    # --- all 5 per-branch 1x1x1 convs of the group as ONE MXU matmul ----------
    P = jnp.dot(X.reshape(T * HW, Cg), W, preferred_element_type=jnp.float32)
    P = P.reshape(T, HW, C5) + b_ref[0]               # f32; branch-1 BN already folded

    P1 = P[:, :, 0:Cb]                                # branch 1: identity after 1x1

    # --- branches 2-4: depthwise temporal convs on the mid slice only ---------
    # no padded full-width copy of P: the VMEM scratch holds P_mid in its
    # interior with zero border rows; every tap is a leading-axis static slice.
    zrow = jnp.zeros((MAXD, HW, W3), jnp.float32)
    pbuf[0:MAXD] = zrow
    pbuf[MAXD + T:MAXD + T + MAXD] = zrow
    pbuf[MAXD:MAXD + T] = P[:, :, Cb:4 * Cb]

    taps = taps_ref[0]                                # (7, W3), BN of b2-b4 folded
    acc = dwb_ref[0]                                  # (1, W3) -> broadcasts over (T, HW, W3)
    for s in range(-MAXD, MAXD + 1):                  # shifts along T (leading axis) only
        acc = acc + taps[s + MAXD:s + MAXD + 1] * pbuf[MAXD + s:MAXD + s + T]

    # --- branch 5: temporal MaxPool(k=2, s=1) on its Cb slice only -------------
    # y5[t] = max(p5[t], p5[t-1]) for t >= 1 ; y5[0] = max(p5[0], p5[1]).
    # BatchNorm (running stats) is applied AFTER the pool, as in the reference.
    P5 = P[:, :, 4 * Cb:C5]
    prev = jnp.concatenate([P5[1:2], P5[:-1]], axis=0)     # partner of row 0 is P5[1]
    y5 = jnp.maximum(P5, prev) * bn5_ref[0, 0:1] + bn5_ref[0, 1:2]
    return P1, acc, y5


def tc_group_kernel(x_ref, w_ref, b_ref, taps_ref, dwb_ref, bn5_ref, o_ref, pbuf):
    """Intermediate Timeception layer: o_ref (1, 1, T//2, HW, C5) bf16."""
    P1, acc, y5 = _tc_branches(x_ref, w_ref, b_ref, taps_ref, dwb_ref, bn5_ref, pbuf)
    T, HW = P1.shape[0], P1.shape[1]

    def relu_pool(z):                                  # ReLU + temporal MaxPool(k=2, s=2)
        z = jnp.maximum(z, 0.0)
        return z.reshape(T // 2, 2, HW, z.shape[-1]).max(axis=1)

    y = jnp.concatenate([relu_pool(P1), relu_pool(acc), relu_pool(y5)], axis=-1)
    o_ref[0, 0] = y.astype(o_ref.dtype)                # single full-block store


def tc_group_pool_kernel(x_ref, w_ref, b_ref, taps_ref, dwb_ref, bn5_ref, o_ref, pbuf,
                         *, hw_valid):
    """Last Timeception layer with the head's global max fused in.

    Emits (1, 1, 1, C5) pooled features (max over all t, hw) instead of the full
    activation tensor. ReLU commutes with max; the layer-level temporal pool and
    the reference's final channel shuffle are absorbed by the global max and the
    head-weight row ordering.
    """
    P1, acc, y5 = _tc_branches(x_ref, w_ref, b_ref, taps_ref, dwb_ref, bn5_ref, pbuf)
    HW = P1.shape[1]

    if hw_valid < HW:                                  # mask spatial padding rows
        keep = jax.lax.broadcasted_iota(jnp.int32, (1, HW, 1), 1) < hw_valid
        neg = jnp.float32(-1e30)
        P1 = jnp.where(keep, P1, neg)
        acc = jnp.where(keep, acc, neg)
        y5 = jnp.where(keep, y5, neg)

    def gmax(z):                                       # global max over (T, HW)
        return jnp.max(jnp.max(z, axis=0), axis=0, keepdims=True)

    feat = jnp.concatenate([gmax(P1), gmax(acc), gmax(y5)], axis=-1)   # (1, C5)
    o_ref[0, 0] = jnp.maximum(feat, 0.0).astype(o_ref.dtype)           # ReLU after max


def timeception_layer(x, p, pool_output=False, hw_valid=None):
    """x: (G, N, T, HW, Cg) bf16.

    pool_output=False -> (G, N, T//2, HW, C5) bf16
    pool_output=True  -> (G, N, 1, C5)        f32  (global-max features, head fused)
    """
    G, N, T, HW, Cg = x.shape
    C5 = p["w_all"].shape[-1]
    Cb = C5 // N_BRANCHES
    W3 = 3 * Cb
    assert T % 2 == 0, "temporal length must stay even through the layer stack"
    hw_valid = HW if hw_valid is None else hw_valid

    in_specs = [
        pl.BlockSpec((1, 1, T, HW, Cg), lambda g, n: (g, n, 0, 0, 0)),
        pl.BlockSpec((1, Cg, C5), lambda g, n: (g, 0, 0)),
        pl.BlockSpec((1, 1, C5), lambda g, n: (g, 0, 0)),
        pl.BlockSpec((1, 2 * MAXD + 1, W3), lambda g, n: (g, 0, 0)),
        pl.BlockSpec((1, 1, W3), lambda g, n: (g, 0, 0)),
        pl.BlockSpec((1, 2, Cb), lambda g, n: (g, 0, 0)),
    ]
    scratch = [pltpu.VMEM((T + 2 * MAXD, HW, W3), jnp.float32)]
    cp = pltpu.CompilerParams(
        dimension_semantics=("parallel", "parallel"),   # megacore over (group, sample)
        vmem_limit_bytes=_vmem_limit_bytes())
    args = (x, p["w_all"], p["b_all"], p["taps"], p["dwb"], p["bn5"])

    if pool_output:
        kern = functools.partial(tc_group_pool_kernel, hw_valid=hw_valid)
        return pl.pallas_call(
            kern, grid=(G, N), in_specs=in_specs,
            out_specs=pl.BlockSpec((1, 1, 1, C5), lambda g, n: (g, n, 0, 0)),
            out_shape=jax.ShapeDtypeStruct((G, N, 1, C5), jnp.float32),
            scratch_shapes=scratch, compiler_params=cp,
        )(*args)

    return pl.pallas_call(
        tc_group_kernel, grid=(G, N), in_specs=in_specs,
        out_specs=pl.BlockSpec((1, 1, T // 2, HW, C5), lambda g, n: (g, n, 0, 0, 0)),
        out_shape=jax.ShapeDtypeStruct((G, N, T // 2, HW, C5), jnp.bfloat16),
        scratch_shapes=scratch, compiler_params=cp,
    )(*args)


def shuffle_regroup(y, fast):
    """Channel shuffle + re-grouping between Timeception layers (single HBM pass).

    fast=True : minor-dim-preserving permutation (lane axis untouched); the
                within-group channel reordering it introduces is compensated by
                the next layer's pre-permuted pointwise-weight rows.
    fast=False: canonical explicit concat -> shuffle -> regroup fallback.
    """
    G, N, T, HW, C5 = y.shape
    if fast:
        m = C5 // G
        y6 = y.reshape(G, N, T, HW, G, m)
        return jnp.transpose(y6, (4, 1, 2, 3, 0, 5)).reshape(G, N, T, HW, C5)
    yc = jnp.transpose(y, (1, 2, 3, 0, 4)).reshape(N, T, HW, G * C5)
    ysh = jnp.swapaxes(yc.reshape(N, T, HW, G, C5), -1, -2).reshape(N, T, HW, G * C5)
    return jnp.transpose(ysh.reshape(N, T, HW, G, C5), (3, 0, 1, 2, 4))


# ----------------------------------------------------------------------------
# Classifier head: (global max already fused into the last TC layer) ->
# Linear(+BN folded) -> LeakyReLU(0.2) -> Linear -> Sigmoid.  Tiny single-step kernel.
# ----------------------------------------------------------------------------
def head_kernel(f_ref, w1_ref, b1_ref, w2_ref, b2_ref, o_ref):
    f = f_ref[...].astype(jnp.bfloat16)                               # (N, C)
    h = jnp.dot(f, w1_ref[...], preferred_element_type=jnp.float32) + b1_ref[...]
    h = jnp.where(h >= 0, h, 0.2 * h)                                 # LeakyReLU(0.2)
    logits = jnp.dot(h.astype(jnp.bfloat16), w2_ref[...],
                     preferred_element_type=jnp.float32) + b2_ref[...]
    o_ref[...] = jax.nn.sigmoid(logits)                               # 'ml' -> Sigmoid


def classifier_head(pooled, head):
    """pooled: (G, N, 1, C5) f32 features from the fused last layer -> (N, n_classes)."""
    G, N, _, C5 = pooled.shape
    feat = jnp.transpose(pooled[:, :, 0, :], (1, 0, 2)).reshape(N, G * C5)
    n_classes = head["b2"].shape[-1]
    return pl.pallas_call(
        head_kernel,
        out_shape=jax.ShapeDtypeStruct((N, n_classes), jnp.float32),
    )(feat, head["w1"], head["b1"], head["w2"], head["b2"])


# ----------------------------------------------------------------------------
# Parameters (deterministic synthetic init, BN folded / branches fused) + forward
# ----------------------------------------------------------------------------
def make_params(key, c_in, n_groups, n_layers, hidden, n_classes):
    layers = []
    C = c_in
    G = n_groups
    for li in range(n_layers):
        Cg = C // G
        Cb = int(C * EXPANSION_FACTOR / float(N_BRANCHES * G))
        C5 = N_BRANCHES * Cb
        W3 = 3 * Cb
        key, *ks = jax.random.split(key, 9)
        wpw = jax.random.normal(ks[0], (G, 5, Cg, Cb), jnp.float32) / jnp.sqrt(Cg)
        bpw = 0.01 * jax.random.normal(ks[1], (G, 5, Cb), jnp.float32)
        dww = 0.5 * jax.random.normal(ks[2], (G, 3, 3, Cb), jnp.float32)
        dwb = 0.01 * jax.random.normal(ks[3], (G, 3, Cb), jnp.float32)
        # one BatchNorm per branch (b1: after conv, b2-4: after depthwise, b5: after pool)
        gamma = 1.0 + 0.1 * jax.random.normal(ks[4], (G, 5, Cb), jnp.float32)
        beta = 0.1 * jax.random.normal(ks[5], (G, 5, Cb), jnp.float32)
        mean = 0.1 * jax.random.normal(ks[6], (G, 5, Cb), jnp.float32)
        var = jnp.ones((G, 5, Cb), jnp.float32)

        scale = gamma * jax.lax.rsqrt(var + BN_EPS)          # BN (running stats) folded
        shift = beta - mean * scale

        # fuse the 5 pointwise convs (branch-major outputs); fold BN of branch 1.
        w_all = jnp.concatenate(
            [wpw[:, 0] * scale[:, 0][:, None, :]] + [wpw[:, b] for b in range(1, 5)],
            axis=-1)                                          # (G, Cg, C5)
        b_all = jnp.concatenate(
            [bpw[:, 0] * scale[:, 0] + shift[:, 0]] + [bpw[:, b] for b in range(1, 5)],
            axis=-1)[:, None, :]                              # (G, 1, C5)

        # branches 2-4 only: temporal taps for shifts -3..+3 over the mid slice,
        # with each branch's BN folded into taps + bias.
        taps = jnp.zeros((G, 2 * MAXD + 1, W3), jnp.float32)
        dwb_all = jnp.zeros((G, W3), jnp.float32)
        for bi, d in enumerate(DILATIONS):
            sl = slice(bi * Cb, (bi + 1) * Cb)
            s_b = scale[:, bi + 1]
            taps = taps.at[:, MAXD - d, sl].set(dww[:, bi, 0] * s_b)   # coeff of in[t-d]
            taps = taps.at[:, MAXD, sl].set(dww[:, bi, 1] * s_b)       # coeff of in[t]
            taps = taps.at[:, MAXD + d, sl].set(dww[:, bi, 2] * s_b)   # coeff of in[t+d]
            dwb_all = dwb_all.at[:, sl].set(dwb[:, bi] * s_b + shift[:, bi + 1])

        # branch 5: BN is applied AFTER the temporal max-pool in the reference, so it
        # cannot be folded into the conv weights; pass per-channel scale/shift instead.
        bn5 = jnp.stack([scale[:, 4], shift[:, 4]], axis=1)            # (G, 2, Cb)

        # minor-dim-preserving inter-layer shuffle: permute this layer's weight
        # rows so the lane-friendly shuffle is numerically identical to the
        # canonical concat->shuffle->regroup ordering (layers >= 1 only).
        fast_shuffle = (li > 0) and (Cg % G == 0)
        if fast_shuffle:
            m = Cg // G
            jp = jnp.arange(Cg)
            perm = (jp % m) * G + (jp // m)
            w_all = w_all[:, perm, :]

        layers.append(dict(w_all=w_all.astype(jnp.bfloat16), b_all=b_all,
                           taps=taps, dwb=dwb_all[:, None, :], bn5=bn5,
                           fast_shuffle=fast_shuffle))
        C = C5 * G

    # classifier head; BatchNorm1d folded into l1. w1 rows follow the
    # (group-major, branch-major) channel order produced by the last TC layer;
    # this equals the reference ordering up to the final channel shuffle, which
    # the permutation-invariant global max + Linear absorb into the row order.
    key, k1, k2, k3, k4, k5, k6, k7 = jax.random.split(key, 8)
    w1 = jax.random.normal(k1, (C, hidden), jnp.float32) / jnp.sqrt(C)
    b1 = 0.01 * jax.random.normal(k2, (1, hidden), jnp.float32)
    gamma1 = 1.0 + 0.1 * jax.random.normal(k3, (1, hidden), jnp.float32)
    beta1 = 0.1 * jax.random.normal(k4, (1, hidden), jnp.float32)
    mean1 = 0.1 * jax.random.normal(k5, (1, hidden), jnp.float32)
    var1 = jnp.ones((1, hidden), jnp.float32)
    s1 = gamma1 * jax.lax.rsqrt(var1 + BN_EPS)
    w1f = w1 * s1
    b1f = b1 * s1 + (beta1 - mean1 * s1)
    w2 = jax.random.normal(k6, (hidden, n_classes), jnp.float32) / jnp.sqrt(hidden)
    b2 = 0.01 * jax.random.normal(k7, (1, n_classes), jnp.float32)
    head = dict(w1=w1f.astype(jnp.bfloat16), b1=b1f,
                w2=w2.astype(jnp.bfloat16), b2=b2)
    return layers, head, C


def model_forward(x_ncthw, layers, head, n_groups):
    """x_ncthw: (N, C, T, H, W), same layout as the PyTorch module input."""
    N, C, T, H, W = x_ncthw.shape
    G = n_groups
    Cg = C // G
    HW = H * W
    HW_pad = ((HW + 7) // 8) * 8                       # sublane-align the spatial axis
    # single layout pass: NCTHW -> (G, N, T, HW, Cg) group-major channels-last, bf16
    x = jnp.transpose(x_ncthw.reshape(N, G, Cg, T, HW),
                      (1, 0, 3, 4, 2)).astype(jnp.bfloat16)
    if HW_pad != HW:
        x = jnp.pad(x, ((0, 0), (0, 0), (0, 0), (0, HW_pad - HW), (0, 0)))

    n_layers = len(layers)
    for li, p in enumerate(layers):                    # Timeception layers
        last = (li == n_layers - 1)
        x = timeception_layer(x, p, pool_output=last, hw_valid=HW)
        if not last:
            x = shuffle_regroup(x, fast=layers[li + 1]["fast_shuffle"])
    return classifier_head(x, head)
    # TODO(synk): Dropout / training-mode BatchNorm statistics are not modeled
    # (inference semantics: dropout = identity, BN running stats folded into weights).


if __name__ == "__main__":
    # Small synthetic config consistent with the module:
    #   input (N, C, T, H, W), n_groups (real cfg uses C/128), 2 TC layers,
    #   multi-label output (Sigmoid).
    N, C_in, T, H, W = 2, 32, 8, 4, 4
    n_groups = 2
    n_tc_layers = 2
    hidden = 512
    n_classes = 10

    key = jax.random.PRNGKey(0)
    key, kx = jax.random.split(key)
    x = jax.random.normal(kx, (N, C_in, T, H, W), jnp.float32)

    layers, head, c_out = make_params(key, C_in, n_groups, n_tc_layers, hidden, n_classes)
    out = model_forward(x, layers, head, n_groups)
    out = jax.block_until_ready(out)
    assert out.shape == (N, n_classes)
    assert bool(jnp.all(jnp.isfinite(out)))
    print("KERNEL_OK")
</pallas_src>

<mosaic_0001>
module attributes {stable_mosaic.version = 11 : i64} {
  func.func @tc_group_kernel(%arg0: i32, %arg1: i32, %arg2: memref<1x1x8x16x16xbf16, #tpu.memory_space<vmem>>, %arg3: memref<1x16x20xbf16, #tpu.memory_space<vmem>>, %arg4: memref<1x1x20xf32, #tpu.memory_space<vmem>>, %arg5: memref<1x7x12xf32, #tpu.memory_space<vmem>>, %arg6: memref<1x1x12xf32, #tpu.memory_space<vmem>>, %arg7: memref<1x2x4xf32, #tpu.memory_space<vmem>>, %arg8: memref<1x1x4x16x20xbf16, #tpu.memory_space<vmem>>, %arg9: memref<14x16x12xf32, #tpu.memory_space<vmem>>) attributes {dimension_semantics = [#tpu.dimension_semantics<parallel>, #tpu.dimension_semantics<parallel>], iteration_bounds = array<i64: 2, 2>, scalar_prefetch = 0 : i64, scratch_operands = 1 : i64, tpu.core_type = #tpu.core_type<tc>, window_params = [{transform_indices = @transform_0, window_bounds = array<i64: 1, 1, 8, 16, 16>}, {transform_indices = @transform_1, window_bounds = array<i64: 1, 16, 20>}, {transform_indices = @transform_2, window_bounds = array<i64: 1, 1, 20>}, {transform_indices = @transform_3, window_bounds = array<i64: 1, 7, 12>}, {transform_indices = @transform_4, window_bounds = array<i64: 1, 1, 12>}, {transform_indices = @transform_5, window_bounds = array<i64: 1, 2, 4>}, {transform_indices = @transform_6, window_bounds = array<i64: 1, 1, 4, 16, 20>}]} {
    %c0 = arith.constant 0 : index
    %c0_0 = arith.constant 0 : index
    %c0_1 = arith.constant 0 : index
    %c0_2 = arith.constant 0 : index
    %c0_3 = arith.constant 0 : index
    %0 = vector.load %arg2[%c0, %c0_0, %c0_1, %c0_2, %c0_3] : memref<1x1x8x16x16xbf16, #tpu.memory_space<vmem>>, vector<1x1x8x16x16xbf16>
    %1 = vector.shape_cast %0 : vector<1x1x8x16x16xbf16> to vector<8x16x16xbf16>
    %c0_4 = arith.constant 0 : index
    %c0_5 = arith.constant 0 : index
    %c0_6 = arith.constant 0 : index
    %2 = vector.load %arg3[%c0_4, %c0_5, %c0_6] : memref<1x16x20xbf16, #tpu.memory_space<vmem>>, vector<1x16x20xbf16>
    %3 = vector.shape_cast %2 : vector<1x16x20xbf16> to vector<16x20xbf16>
    %4 = vector.shape_cast %1 : vector<8x16x16xbf16> to vector<128x16xbf16>
    %cst = arith.constant dense<0.000000e+00> : vector<128x20xf32>
    %5 = tpu.matmul %4, %3, %cst {dimension_numbers = #tpu.dot_dimension_numbers<[1], [0], [0], [1], [0, 0, 1, 1], [], []>} : vector<128x16xbf16>, vector<16x20xbf16>, vector<128x20xf32> -> vector<128x20xf32>
    %6 = vector.shape_cast %5 : vector<128x20xf32> to vector<8x16x20xf32>
    %c0_7 = arith.constant 0 : index
    %c0_8 = arith.constant 0 : index
    %c0_9 = arith.constant 0 : index
    %7 = vector.load %arg4[%c0_7, %c0_8, %c0_9] : memref<1x1x20xf32, #tpu.memory_space<vmem>>, vector<1x1x20xf32>
    %8 = vector.shape_cast %7 : vector<1x1x20xf32> to vector<1x20xf32>
    %9 = vector.shape_cast %8 : vector<1x20xf32> to vector<1x1x20xf32>
    %10 = vector.broadcast %9 : vector<1x1x20xf32> to vector<8x16x20xf32>
    %11 = arith.addf %6, %10 : vector<8x16x20xf32>
    %12 = vector.extract_strided_slice %11 {offsets = [0, 0, 0], sizes = [8, 16, 4], strides = [1, 1, 1]} : vector<8x16x20xf32> to vector<8x16x4xf32>
    %cst_10 = arith.constant 0.000000e+00 : f32
    %13 = vector.broadcast %cst_10 : f32 to vector<3x16x12xf32>
    %c0_11 = arith.constant 0 : index
    %c0_12 = arith.constant 0 : index
    %c0_13 = arith.constant 0 : index
    %14 = vector.load %arg9[%c0_11, %c0_12, %c0_13] : memref<14x16x12xf32, #tpu.memory_space<vmem>>, vector<3x16x12xf32>
    tpu.vector_store %arg9[%c0_11, %c0_12, %c0_13], %13 {strides = array<i32>} : memref<14x16x12xf32, #tpu.memory_space<vmem>>, vector<3x16x12xf32>,
    %c11 = arith.constant 11 : index
    %c0_14 = arith.constant 0 : index
    %c0_15 = arith.constant 0 : index
    %15 = vector.load %arg9[%c11, %c0_14, %c0_15] : memref<14x16x12xf32, #tpu.memory_space<vmem>>, vector<3x16x12xf32>
    tpu.vector_store %arg9[%c11, %c0_14, %c0_15], %13 {strides = array<i32>} : memref<14x16x12xf32, #tpu.memory_space<vmem>>, vector<3x16x12xf32>,
    %16 = vector.extract_strided_slice %11 {offsets = [0, 0, 4], sizes = [8, 16, 12], strides = [1, 1, 1]} : vector<8x16x20xf32> to vector<8x16x12xf32>
    %c3 = arith.constant 3 : index
    %c0_16 = arith.constant 0 : index
    %c0_17 = arith.constant 0 : index
    %17 = vector.load %arg9[%c3, %c0_16, %c0_17] : memref<14x16x12xf32, #tpu.memory_space<vmem>>, vector<8x16x12xf32>
    tpu.vector_store %arg9[%c3, %c0_16, %c0_17], %16 {strides = array<i32>} : memref<14x16x12xf32, #tpu.memory_space<vmem>>, vector<8x16x12xf32>,
    %c0_18 = arith.constant 0 : index
    %c0_19 = arith.constant 0 : index
    %c0_20 = arith.constant 0 : index
    %18 = vector.load %arg5[%c0_18, %c0_19, %c0_20] : memref<1x7x12xf32, #tpu.memory_space<vmem>>, vector<1x7x12xf32>
    %19 = vector.shape_cast %18 : vector<1x7x12xf32> to vector<7x12xf32>
    %c0_21 = arith.constant 0 : index
    %c0_22 = arith.constant 0 : index
    %c0_23 = arith.constant 0 : index
    %20 = vector.load %arg6[%c0_21, %c0_22, %c0_23] : memref<1x1x12xf32, #tpu.memory_space<vmem>>, vector<1x1x12xf32>
    %21 = vector.shape_cast %20 : vector<1x1x12xf32> to vector<1x12xf32>
    %22 = vector.extract_strided_slice %19 {offsets = [0, 0], sizes = [1, 12], strides = [1, 1]} : vector<7x12xf32> to vector<1x12xf32>
    %c0_24 = arith.constant 0 : index
    %c0_25 = arith.constant 0 : index
    %c0_26 = arith.constant 0 : index
    %23 = vector.load %arg9[%c0_24, %c0_25, %c0_26] : memref<14x16x12xf32, #tpu.memory_space<vmem>>, vector<8x16x12xf32>
    %24 = vector.shape_cast %22 : vector<1x12xf32> to vector<1x1x12xf32>
    %25 = vector.broadcast %24 : vector<1x1x12xf32> to vector<8x16x12xf32>
    %26 = arith.mulf %25, %23 : vector<8x16x12xf32>
    %27 = vector.shape_cast %21 : vector<1x12xf32> to vector<1x1x12xf32>
    %28 = vector.broadcast %27 : vector<1x1x12xf32> to vector<8x16x12xf32>
    %29 = arith.addf %28, %26 : vector<8x16x12xf32>
    %30 = vector.extract_strided_slice %19 {offsets = [1, 0], sizes = [1, 12], strides = [1, 1]} : vector<7x12xf32> to vector<1x12xf32>
    %c1 = arith.constant 1 : index
    %c0_27 = arith.constant 0 : index
    %c0_28 = arith.constant 0 : index
    %31 = vector.load %arg9[%c1, %c0_27, %c0_28] : memref<14x16x12xf32, #tpu.memory_space<vmem>>, vector<8x16x12xf32>
    %32 = vector.shape_cast %30 : vector<1x12xf32> to vector<1x1x12xf32>
    %33 = vector.broadcast %32 : vector<1x1x12xf32> to vector<8x16x12xf32>
    %34 = arith.mulf %33, %31 : vector<8x16x12xf32>
    %35 = arith.addf %29, %34 : vector<8x16x12xf32>
    %36 = vector.extract_strided_slice %19 {offsets = [2, 0], sizes = [1, 12], strides = [1, 1]} : vector<7x12xf32> to vector<1x12xf32>
    %c2 = arith.constant 2 : index
    %c0_29 = arith.constant 0 : index
    %c0_30 = arith.constant 0 : index
    %37 = vector.load %arg9[%c2, %c0_29, %c0_30] : memref<14x16x12xf32, #tpu.memory_space<vmem>>, vector<8x16x12xf32>
    %38 = vector.shape_cast %36 : vector<1x12xf32> to vector<1x1x12xf32>
    %39 = vector.broadcast %38 : vector<1x1x12xf32> to vector<8x16x12xf32>
    %40 = arith.mulf %39, %37 : vector<8x16x12xf32>
    %41 = arith.addf %35, %40 : vector<8x16x12xf32>
    %42 = vector.extract_strided_slice %19 {offsets = [3, 0], sizes = [1, 12], strides = [1, 1]} : vector<7x12xf32> to vector<1x12xf32>
    %c3_31 = arith.constant 3 : index
    %c0_32 = arith.constant 0 : index
    %c0_33 = arith.constant 0 : index
    %43 = vector.load %arg9[%c3_31, %c0_32, %c0_33] : memref<14x16x12xf32, #tpu.memory_space<vmem>>, vector<8x16x12xf32>
    %44 = vector.shape_cast %42 : vector<1x12xf32> to vector<1x1x12xf32>
    %45 = vector.broadcast %44 : vector<1x1x12xf32> to vector<8x16x12xf32>
    %46 = arith.mulf %45, %43 : vector<8x16x12xf32>
    %47 = arith.addf %41, %46 : vector<8x16x12xf32>
    %48 = vector.extract_strided_slice %19 {offsets = [4, 0], sizes = [1, 12], strides = [1, 1]} : vector<7x12xf32> to vector<1x12xf32>
    %c4 = arith.constant 4 : index
    %c0_34 = arith.constant 0 : index
    %c0_35 = arith.constant 0 : index
    %49 = vector.load %arg9[%c4, %c0_34, %c0_35] : memref<14x16x12xf32, #tpu.memory_space<vmem>>, vector<8x16x12xf32>
    %50 = vector.shape_cast %48 : vector<1x12xf32> to vector<1x1x12xf32>
    %51 = vector.broadcast %50 : vector<1x1x12xf32> to vector<8x16x12xf32>
    %52 = arith.mulf %51, %49 : vector<8x16x12xf32>
    %53 = arith.addf %47, %52 : vector<8x16x12xf32>
    %54 = vector.extract_strided_slice %19 {offsets = [5, 0], sizes = [1, 12], strides = [1, 1]} : vector<7x12xf32> to vector<1x12xf32>
    %c5 = arith.constant 5 : index
    %c0_36 = arith.constant 0 : index
    %c0_37 = arith.constant 0 : index
    %55 = vector.load %arg9[%c5, %c0_36, %c0_37] : memref<14x16x12xf32, #tpu.memory_space<vmem>>, vector<8x16x12xf32>
    %56 = vector.shape_cast %54 : vector<1x12xf32> to vector<1x1x12xf32>
    %57 = vector.broadcast %56 : vector<1x1x12xf32> to vector<8x16x12xf32>
    %58 = arith.mulf %57, %55 : vector<8x16x12xf32>
    %59 = arith.addf %53, %58 : vector<8x16x12xf32>
    %60 = vector.extract_strided_slice %19 {offsets = [6, 0], sizes = [1, 12], strides = [1, 1]} : vector<7x12xf32> to vector<1x12xf32>
    %c6 = arith.constant 6 : index
    %c0_38 = arith.constant 0 : index
    %c0_39 = arith.constant 0 : index
    %61 = vector.load %arg9[%c6, %c0_38, %c0_39] : memref<14x16x12xf32, #tpu.memory_space<vmem>>, vector<8x16x12xf32>
    %62 = vector.shape_cast %60 : vector<1x12xf32> to vector<1x1x12xf32>
    %63 = vector.broadcast %62 : vector<1x1x12xf32> to vector<8x16x12xf32>
    %64 = arith.mulf %63, %61 : vector<8x16x12xf32>
    %65 = arith.addf %59, %64 : vector<8x16x12xf32>
    %66 = vector.extract_strided_slice %11 {offsets = [0, 0, 16], sizes = [8, 16, 4], strides = [1, 1, 1]} : vector<8x16x20xf32> to vector<8x16x4xf32>
    %67 = vector.extract_strided_slice %66 {offsets = [1, 0, 0], sizes = [1, 16, 4], strides = [1, 1, 1]} : vector<8x16x4xf32> to vector<1x16x4xf32>
    %68 = vector.extract_strided_slice %66 {offsets = [0, 0, 0], sizes = [7, 16, 4], strides = [1, 1, 1]} : vector<8x16x4xf32> to vector<7x16x4xf32>
    %69 = tpu.concatenate %67, %68 in 0 : vector<1x16x4xf32>, vector<7x16x4xf32> -> vector<8x16x4xf32>
    %70 = arith.maximumf %66, %69 : vector<8x16x4xf32>
    %c0_40 = arith.constant 0 : index
    %c0_41 = arith.constant 0 : index
    %c0_42 = arith.constant 0 : index
    %71 = vector.load %arg7[%c0_40, %c0_41, %c0_42] : memref<1x2x4xf32, #tpu.memory_space<vmem>>, vector<1x1x4xf32>
    %72 = vector.shape_cast %71 : vector<1x1x4xf32> to vector<1x4xf32>
    %73 = vector.shape_cast %72 : vector<1x4xf32> to vector<1x1x4xf32>
    %74 = vector.broadcast %73 : vector<1x1x4xf32> to vector<8x16x4xf32>
    %75 = arith.mulf %70, %74 : vector<8x16x4xf32>
    %c0_43 = arith.constant 0 : index
    %c1_44 = arith.constant 1 : index
    %c0_45 = arith.constant 0 : index
    %76 = vector.load %arg7[%c0_43, %c1_44, %c0_45] : memref<1x2x4xf32, #tpu.memory_space<vmem>>, vector<1x1x4xf32>
    %77 = vector.shape_cast %76 : vector<1x1x4xf32> to vector<1x4xf32>
    %78 = vector.shape_cast %77 : vector<1x4xf32> to vector<1x1x4xf32>
    %79 = vector.broadcast %78 : vector<1x1x4xf32> to vector<8x16x4xf32>
    %80 = arith.addf %75, %79 : vector<8x16x4xf32>
    %cst_46 = arith.constant 0.000000e+00 : f32
    %81 = vector.broadcast %cst_46 : f32 to vector<8x16x4xf32>
    %82 = arith.maximumf %12, %81 : vector<8x16x4xf32>
    %83 = vector.shape_cast %82 : vector<8x16x4xf32> to vector<4x2x16x4xf32>
    %cst_47 = arith.constant dense<0xFF800000> : vector<4x16x4xf32>
    %84 = vector.multi_reduction <maximumf>, %83, %cst_47 [1] : vector<4x2x16x4xf32> to vector<4x16x4xf32>
    %cst_48 = arith.constant 0.000000e+00 : f32
    %85 = vector.broadcast %cst_48 : f32 to vector<8x16x12xf32>
    %86 = arith.maximumf %65, %85 : vector<8x16x12xf32>
    %87 = vector.shape_cast %86 : vector<8x16x12xf32> to vector<4x2x16x12xf32>
    %cst_49 = arith.constant dense<0xFF800000> : vector<4x16x12xf32>
    %88 = vector.multi_reduction <maximumf>, %87, %cst_49 [1] : vector<4x2x16x12xf32> to vector<4x16x12xf32>
    %cst_50 = arith.constant 0.000000e+00 : f32
    %89 = vector.broadcast %cst_50 : f32 to vector<8x16x4xf32>
    %90 = arith.maximumf %80, %89 : vector<8x16x4xf32>
    %91 = vector.shape_cast %90 : vector<8x16x4xf32> to vector<4x2x16x4xf32>
    %cst_51 = arith.constant dense<0xFF800000> : vector<4x16x4xf32>
    %92 = vector.multi_reduction <maximumf>, %91, %cst_51 [1] : vector<4x2x16x4xf32> to vector<4x16x4xf32>
    %93 = tpu.concatenate %84, %88, %92 in 2 : vector<4x16x4xf32>, vector<4x16x12xf32>, vector<4x16x4xf32> -> vector<4x16x20xf32>
    %94 = arith.truncf %93 : vector<4x16x20xf32> to vector<4x16x20xbf16>
    %c0_52 = arith.constant 0 : index
    %c0_53 = arith.constant 0 : index
    %c0_54 = arith.constant 0 : index
    %c0_55 = arith.constant 0 : index
    %c0_56 = arith.constant 0 : index
    %95 = vector.load %arg8[%c0_52, %c0_53, %c0_54, %c0_55, %c0_56] : memref<1x1x4x16x20xbf16, #tpu.memory_space<vmem>>, vector<1x1x4x16x20xbf16>
    %96 = vector.shape_cast %95 : vector<1x1x4x16x20xbf16> to vector<4x16x20xbf16>
    %97 = vector.shape_cast %94 : vector<4x16x20xbf16> to vector<1x1x4x16x20xbf16>
    tpu.vector_store %arg8[%c0_52, %c0_53, %c0_54, %c0_55, %c0_56], %97 {strides = array<i32>} : memref<1x1x4x16x20xbf16, #tpu.memory_space<vmem>>, vector<1x1x4x16x20xbf16>,
    return
  }
  func.func @transform_0(%arg0: i32, %arg1: i32) -> (i32, i32, i32, i32, i32) {
    %c0_i32 = arith.constant 0 : i32
    %c0_i32_0 = arith.constant 0 : i32
    %c0_i32_1 = arith.constant 0 : i32
    %c0_i32_2 = arith.constant 0 : i32
    return %arg0, %arg1, %c0_i32, %c0_i32_0, %c0_i32_1 : i32, i32, i32, i32, i32
  }
  func.func @transform_1(%arg0: i32, %arg1: i32) -> (i32, i32, i32) {
    %c0_i32 = arith.constant 0 : i32
    %c0_i32_0 = arith.constant 0 : i32
    %c0_i32_1 = arith.constant 0 : i32
    return %arg0, %c0_i32, %c0_i32_0 : i32, i32, i32
  }
  func.func @transform_2(%arg0: i32, %arg1: i32) -> (i32, i32, i32) {
    %c0_i32 = arith.constant 0 : i32
    %c0_i32_0 = arith.constant 0 : i32
    %c0_i32_1 = arith.constant 0 : i32
    return %arg0, %c0_i32, %c0_i32_0 : i32, i32, i32
  }
  func.func @transform_3(%arg0: i32, %arg1: i32) -> (i32, i32, i32) {
    %c0_i32 = arith.constant 0 : i32
    %c0_i32_0 = arith.constant 0 : i32
    %c0_i32_1 = arith.constant 0 : i32
    return %arg0, %c0_i32, %c0_i32_0 : i32, i32, i32
  }
  func.func @transform_4(%arg0: i32, %arg1: i32) -> (i32, i32, i32) {
    %c0_i32 = arith.constant 0 : i32
    %c0_i32_0 = arith.constant 0 : i32
    %c0_i32_1 = arith.constant 0 : i32
    return %arg0, %c0_i32, %c0_i32_0 : i32, i32, i32
  }
  func.func @transform_5(%arg0: i32, %arg1: i32) -> (i32, i32, i32) {
    %c0_i32 = arith.constant 0 : i32
    %c0_i32_0 = arith.constant 0 : i32
    %c0_i32_1 = arith.constant 0 : i32
    return %arg0, %c0_i32, %c0_i32_0 : i32, i32, i32
  }
  func.func @transform_6(%arg0: i32, %arg1: i32) -> (i32, i32, i32, i32, i32) {
    %c0_i32 = arith.constant 0 : i32
    %c0_i32_0 = arith.constant 0 : i32
    %c0_i32_1 = arith.constant 0 : i32
    %c0_i32_2 = arith.constant 0 : i32
    return %arg0, %arg1, %c0_i32, %c0_i32_0, %c0_i32_1 : i32, i32, i32, i32, i32
  }
}

</mosaic_0001>

<bundles_post_ra>
// kernel: tpu_custom_call.1
= control target key start
LH: loop header
LB: loop body
LE: loop exit
PB: predicated region body
PF: predicated region fallthrough
CT: control target
= control target key end

     0   :  { %11 = vsyncpa [#allocation4], 0  ;;  %s2666_s0 = inlined_call_operand.hbm [shape: bf16[2,2,8,16,16], index: 0, kind: input, shape index: {}]   ;;  %s2667_s1 = inlined_call_operand.vmem [shape: bf16[2,16,20], index: 1, kind: input, shape index: {}]   ;;  %s2668_s2 = inlined_call_operand.vmem [shape: f32[2,1,20], index: 2, kind: input, shape index: {}]   ;;  %s2669_s3 = inlined_call_operand.vmem [shape: f32[2,7,12], index: 3, kind: input, shape index: {}]   ;;  %s2670_s4 = inlined_call_operand.vmem [shape: f32[2,1,12], index: 4, kind: input, shape index: {}]   ;;  %s2671_s5 = inlined_call_operand.vmem [shape: f32[2,2,4], index: 5, kind: input, shape index: {}]   ;;  %s2672_s6 = inlined_call_operand.hbm [shape: bf16[2,2,4,16,20], index: 6, kind: output, shape index: {}]  }
   0x1   :  { %13 = vsyncpa [#allocation4 + $0x1], 0 }
   0x2   :  { %14 = vsyncpa [#allocation5], 0 }
   0x3   :  { %16 = vsyncpa [#allocation5 + $0x1], 0  ;;  %s1735_s21 = smov 0   ;;  %s1737_s22 = smov 0  }
   0x4   :  { %s1739_s23 = smov 0   ;;  %s1741_s24 = smov 0  }
   0x5   :  { %s1743_s25 = smov 0   ;;  %s1745_s26 = smov 0  }
   0x6   :  { %s1747_s27 = smov 0   ;;  %s1749_s28 = smov 0  }
   0x7 LB: > { %2726 = sst [smem:[#allocation9_spill]] %s1663_s21  ;;  %s1376_s29 = sadd.s32 4294967295, %s1691_s28   ;;  %s1691_s28 = sphi %s1749_s28, %s22_s28   ;;  %s1687_s27 = sphi %s1747_s27, %s2873_s27   ;;  %s1683_s26 = sphi %s1745_s26, %s2872_s26   ;;  %s1679_s25 = sphi %s1743_s25, %s2871_s25   ;;  %s1675_s24 = sphi %s1741_s24, %s2870_s24   ;;  %s1671_s23 = sphi %s1739_s23, %s2865_s23   ;;  %s1667_s22 = sphi %s1737_s22, %s2869_s22   ;;  %s1663_s21 = sphi %s1735_s21, %s2868_s21  }
   0x8   : > { %2727 = sst [smem:[#allocation10_spill]] %s1671_s23  ;;  %s1377_s30 = sadd.s32 4294967294, %s1691_s28  }
   0x9   : > { %s31_s7 = sadd.s32 1, %s1683_s26  ;;  %s34_s8 = sadd.s32 1, %s1687_s27 }
   0xa   : > { %p32_p0 = scmp.ge.s32.totalorder %s31_s7, 2  ;;  %s43_s9 = sadd.s32 1, %s1671_s23 }
   0xb   : > { %p50_p1 = scmp.ne.s32.totalorder %s1671_s23, %s1667_s22  ;;  %p51_p2 = scmp.eq.s32.totalorder %s1691_s28, 0 }
   0xc   : > { %s2875_s7 = smov (%p32_p0, %s31_s7), 0  ;;  %s2877_s8 = smov (!%p32_p0, %s34_s8), %s1687_s27 }
   0xd   : > { %2728 = sst [smem:[#allocation11_spill]] %s2875_s7  ;;  %s39_s10 = ssub.s32 %s1683_s26, %s2875_s7 }
   0xe   : > { %p1788_p3 = por %p51_p2, %p50_p1  ;;  %p36_p4 = scmp.ge.s32.totalorder %s2877_s8, 2 }
   0xf   : > { %p56_p5 = scmp.ne.s32.totalorder %s1667_s22, %s1663_s21  ;;  %p57_p6 = scmp.eq.s32.totalorder %s1376_s29, 0 }
  0x10   : > { %p212_p7 = scmp.eq.s32.totalorder %s1376_s29, 3  ;;  %s2879_s8 = smov (%p36_p4, %s2877_s8), 0 }
  0x11   : > { %2730 = sst [smem:[#allocation12_spill]] %s2879_s8  ;;  %p1796_p8 = por %p57_p6, %p56_p5 }
  0x12   : > { %p1800_p9 = por %p212_p7, %p50_p1  ;;  %s38_s14 = ssub.s32 %s1687_s27, %s2879_s8 }
  0x13   : > { %p218_p10 = scmp.eq.s32.totalorder %s1377_s30, 3  ;;  %s40_s15 = sor.u32 %s39_s10, %s38_s14 }
  0x14   : > { %p41_p11 = scmp.eq.s32.totalorder %s40_s15, 0  ;;  %p1466_p13 = scmp.lt.s32.totalorder %s1691_s28, 4 }
  0x15   : > { %p1806_p12 = por %p218_p10, %p56_p5  ;;  %s238_s17 = sand.u32 1, %s1671_s23  }
  0x16   : > { %s1813_s18 = scalar_select %p41_p11, %s1671_s23, %s43_s9  }
  0x17   : > { %s2733_s16 = scalar_select %p1806_p12, 1, 0 }
  0x18   : > { %2735 = sst [smem:[#allocation14_spill]] %s1813_s18  ;;  %s1380_s19 = sshll.u32 %s238_s17, 6 }
  0x19   : > { %2734 = sst [smem:[#allocation13_spill]] %s2733_s16  ;;  %s1381_s20 = sshll.u32 %s1683_s26, 4 }
  0x1a   : > { %s1382_s29 = sshll.u32 %s1687_s27, 5  ;;  %s242_s7 = scalar_lea.vmem [#allocation3], %s1380_s19 }
  0x1b   : > { %s252_s21 = sshll.u32 %s242_s7, 4  ;;  %s247_s8 = sadd.s32 %s1382_s29, %s1381_s20  ;;  %s253_s21 = int_to_ptr.vmem [resolvable:$true] %s252_s21 }
  0x1c   : > { %s1383_s30 = sshll.u32 %s247_s8, 2  ;;  %p1459_p0 = pnand %p1466_p13, %p1788_p3 }
  0x1d   : > { %s249_s15 = scalar_lea.hbm %s2666_s0, %s1383_s30  ;;  %s239_s9 = scalar_lea.sflag [#allocation4], %s238_s17 }
  0x1e   : > { %s250_s16 = sshll.u32 %s249_s15, 4  ;;  %s1693_s18 = smov 64   ;;  %s251_s16 = int_to_ptr.hbm [resolvable:$true] %s250_s16 }
  0x1f   : > { %s1694_s23 = smov 4   ;;  %p1384_p1 = scmp.ge.s32.totalorder %s1691_s28, 1 }
  0x20   : > { %1461 = dma.hbm_to_vmem [thread:$0]  (!%p1459_p0), %s251_s16, 1024, %s253_s21, %s239_s9, %s1693_s18, %s1693_s18, %s1694_s23  }
  0x21   : > { %p294_p2 = scmp.lt.s32.totalorder %s1691_s28, 5 }
  0x23   : > { %p295_p4 = pnand %p1384_p1, %p294_p2 }
  0x25   : > { %298 = sbr.rel (%p295_p4) target bundleno = 520 (0x208), region = 44 }
  0x2a   : > { %s1825_s7 = sand.u32 1, %s1667_s22  }
  0x2b   : > { %s1385_s8 = sshll.u32 %s1825_s7, 6  ;;  %s301_s11 = scalar_lea.sflag [#allocation4], %s1825_s7 }
  0x2c   : > { %s304_s19 = scalar_lea.vmem [#allocation3], %s1385_s8 }
  0x2d   : > { %1654 = dma.done.wait (%p1796_p8), %s301_s11, 1024  }
  0x2e   : > { %1656 = vsyncadd (%p1796_p8), %s301_s11, 4294966272  ;;  %p353_p3 = scmp.lt.s32.totalorder %s1679_s25, 1  ;;  %v1442_v1 = vld [vmem:[%s304_s19] sm:$0xff]  ;;  %vm437_vm0 = vcmask 130048   ;;  %v1444_v2 = vld [vmem:[%s304_s19 + $0x10] sm:$0xff]  ;;  %vm1049_vm1 = vcmask 31744  }
  0x2f   : > { %v1446_v3 = vld [vmem:[%s304_s19 + $0x20] sm:$0xff]  ;;  %v1448_v4 = vld [vmem:[%s304_s19 + $0x30] sm:$0xff]  ;;  %v1443_v5 = vld [vmem:[%s304_s19 + $0x8] sm:$0xff]  ;;  %s1696_s16 = smov 16   ;;  %vm531_vm2 = vcmask 97280   ;;  %vm1128_vm3 = vcmask 162944  }
  0x30   : > { %s1835_s21 = scalar_select %p353_p3, %s1679_s25, 1  ;;  %v1445_v6 = vld [vmem:[%s304_s19 + $0x18] sm:$0xff]  ;;  %v1447_v7 = vld [vmem:[%s304_s19 + $0x28] sm:$0xff]  ;;  %vm1205_vm4 = vcmask 158720  }
  0x31   : > { %v1449_v8 = vld [vmem:[%s304_s19 + $0x38] sm:$0xff]  ;;  %s1695_s19 = smov 124   ;;  %s1436_s10 = sshll.u32 %s1675_s24, 3 }
  0x32   : > { %s1441_s23 = sshll.u32 %s1835_s21, 3  ;;  %s360_s12 = scalar_lea.vmem %s2668_s2, %s1835_s21 }
  0x33   : > { %s357_s18 = scalar_lea.vmem %s2667_s1, %s1441_s23  ;;  %s367_s14 = scalar_lea.vmem %s2670_s4, %s1835_s21  ;;  %v1865_v9 = vld [vmem:[%s360_s12] ss:$0 sm:$0xff] }
  0x34   : > { %v1450_v0 = vld [vmem:[%s357_s18] sm:$0xff]  ;;  %s1390_s15 = sshll.u32 %s1835_s21, 1  ;;  %s364_s20 = scalar_lea.vmem %s2669_s3, %s1441_s23 }
  0x35   : > { %469 = vmatpush.bf16.msra.mxu0 %v1450_v0  ;;  %1451 = vmatpush.bf16.msra.mxu1 %v1450_v0  ;;  %s1863_s11 = scalar_lea.vmem %s2671_s5, %s1390_s15  ;;  %s1698_s21 = smov 4  }
  0x36   : > { %1452 = vmatpush.bf16.msra.mxu2 %v1450_v0  ;;  %1453 = vmatpush.bf16.msra.mxu3 %v1450_v0  ;;  %s1386_s12 = sshll.u32 %s1825_s7, 5  ;;  %s1613_s29 = scalar_lea.hbm %s2672_s6, 128 }
  0x37   : > { %s2568_s30 = scalar_lea.vmem [#allocation6], %s1386_s12 }
  0x38   : > { %1427 = vmatmul.msk.bf16.vlgmr.msra.gmra.mxu0 %vm437_vm0, %v1442_v1  ;;  %1429 = vmatmul.msk.bf16.vlgmr.msra.gmra.mxu1 %vm437_vm0, %v1444_v2 }
  0x39   : > { %1431 = vmatmul.msk.bf16.vlgmr.msra.gmra.mxu2 %vm437_vm0, %v1446_v3  ;;  %1433 = vmatmul.msk.bf16.vlgmr.msra.gmra.mxu3 %vm437_vm0, %v1448_v4 }
  0x48   : > { %1428 = vmatmul.msk.bf16.gmra.mxu0 %vm437_vm0, %v1443_v5  ;;  %1430 = vmatmul.msk.bf16.gmra.mxu1 %vm437_vm0, %v1445_v6 }
  0x49   : > { %1432 = vmatmul.msk.bf16.gmra.mxu2 %vm437_vm0, %v1447_v7  ;;  %1434 = vmatmul.msk.bf16.gmra.mxu3 %vm437_vm0, %v1449_v8 }
  0xb5   : > { %v471_v10 = vpop.f32.mrf.mxu0  ;;  %v481_v11 = vpop.f32.mrf.mxu1 }
  0xb6   : > { %v1868_v12 = vadd.f32 %v1865_v9, %v471_v10  ;;  %v1871_v13 = vadd.f32 %v1865_v9, %v481_v11 }
  0xb8   : > { %2736 = vst [vmem:[#allocation15_spill] sm:$0xff] %v1868_v12  ;;  %569 = vrot.lane.b32.xlu2 %v1871_v13, %s1695_s19  ;;  %561 = vrot.lane.b32.xlu0 %v1868_v12, %s1695_s19  ;;  %v1033_v26 = vmax.f32 %v1868_v12, 0.0  ;;  %v1037_v27 = vmax.f32 %v1871_v13, 0.0 }
  0xb9   : > { %2737 = vst [vmem:[#allocation16_spill] sm:$0xff] %v1871_v13 }
  0xba   : > { %v1920_v38 = vsel %vm1049_vm1, %v1033_v26, -inf  ;;  %v1927_v41 = vsel %vm1049_vm1, %v1037_v27, -inf }
  0xbb   : > { %2744 = vst [vmem:[#allocation23_spill] sm:$0xff] %v1920_v38 }
  0xbc   : > { %v491_v14 = vpop.f32.mrf.mxu2  ;;  %v501_v15 = vpop.f32.mrf.mxu3  ;;  %2746 = vst [vmem:[#allocation25_spill] sm:$0xff] %v1927_v41 }
  0xbd   : > { %v1878_v16 = vadd.f32 %v1865_v9, %v491_v14  ;;  %v1881_v17 = vadd.f32 %v1865_v9, %v501_v15  ;;  %v473_v18 = vpop.f32.mrf.mxu0  ;;  %v483_v19 = vpop.f32.mrf.mxu1 }
  0xbe   : > { %v1888_v20 = vadd.f32 %v1865_v9, %v483_v19  ;;  %v1891_v23 = vadd.f32 %v1865_v9, %v473_v18 }
  0xbf   : > { %2738 = vst [vmem:[#allocation17_spill] sm:$0xff] %v1878_v16  ;;  %v1045_v34 = vmax.f32 %v1881_v17, 0.0  ;;  %v1041_v39 = vmax.f32 %v1878_v16, 0.0 }
  0xc0   : > { %2739 = vst [vmem:[#allocation18_spill] sm:$0xff] %v1881_v17  ;;  %577 = vrot.lane.b32.xlu2 %v1878_v16, %s1695_s19  ;;  %585 = vrot.lane.b32.xlu0 %v1881_v17, %s1695_s19  ;;  %v1034_v35 = vmax.f32 %v1891_v23, 0.0  ;;  %v1038_v44 = vmax.f32 %v1888_v20, 0.0 }
  0xc1   : > { %2740 = vst [vmem:[#allocation19_spill] sm:$0xff] %v1888_v20  ;;  %v1947_v51 = vsel %vm1049_vm1, %v1045_v34, -inf  ;;  %v1959_v57 = vsel %vm1049_vm1, %v1041_v39, -inf }
  0xc2   : > { %2741 = vst [vmem:[#allocation20_spill] sm:$0xff] %v1891_v23  ;;  %v1938_v48 = vsel %vm1049_vm1, %v1034_v35, -inf  ;;  %v1996_v10 = vsel %vm1049_vm1, %v1038_v44, -inf }
  0xc3   : > { %2748 = vst [vmem:[#allocation27_spill] sm:$0xff] %v1938_v48 }
  0xc4   : > { %v493_v21 = vpop.f32.mrf.mxu2  ;;  %v503_v22 = vpop.f32.mrf.mxu3  ;;  %2751 = vst [vmem:[#allocation30_spill] sm:$0xff] %v1947_v51 }
  0xc5   : > { %v476_v24 = vpop.f32.mrf.mxu0  ;;  %v486_v25 = vpop.f32.mrf.mxu1  ;;  %v1950_v54 = vadd.f32 %v1865_v9, %v493_v21  ;;  %2755 = vst [vmem:[#allocation34_spill] sm:$0xff] %v1959_v57  ;;  %v1977_v2 = vadd.f32 %v1865_v9, %v503_v22 }
  0xc6   : > { %v1896_v28 = vadd.f32 %v1865_v9, %v476_v24  ;;  %v1899_v29 = vadd.f32 %v1865_v9, %v486_v25  ;;  %2760 = vst [vmem:[#allocation39_spill] sm:$0xff] %v1996_v10 }
  0xc7   : > { %2752 = vst [vmem:[#allocation31_spill] sm:$0xff] %v1950_v54  ;;  %v1042_v24 = vmax.f32 %v1950_v54, 0.0  ;;  %v1046_v27 = vmax.f32 %v1977_v2, 0.0 }
  0xc8   : > { %2742 = vst [vmem:[#allocation21_spill] sm:$0xff] %v1896_v28  ;;  %v1035_v32 = vmax.f32 %v1896_v28, 0.0  ;;  %571 = vrot.lane.b32.xlu2 %v1888_v20, %s1695_s19  ;;  %563 = vrot.lane.b32.xlu0 %v1891_v23, %s1695_s19  ;;  %v1039_v37 = vmax.f32 %v1899_v29, 0.0 }
  0xc9   : > { %2743 = vst [vmem:[#allocation22_spill] sm:$0xff] %v1899_v29  ;;  %565 = vrot.lane.b32.xlu1 %v1896_v28, %s1695_s19  ;;  %v2032_v39 = vsel %vm1049_vm1, %v1042_v24, -inf  ;;  %v2080_v24 = vld [vmem:[%s367_s14] ss:$0 sm:$0xff]  ;;  %s1437_s14 = sshll.u32 %s1679_s25, 4  ;;  %s1215_s25 = scalar_lea.sflag [#allocation5], %s1825_s7 }
  0xca   : > { %v1924_v40 = vsel %vm1049_vm1, %v1035_v32, -inf  ;;  %v1932_v43 = vsel %vm1049_vm1, %v1039_v37, -inf  ;;  %2756 = vst [vmem:[#allocation35_spill] sm:$0xff] %v1977_v2  ;;  %s1226_s15 = sadd.s32 %s1437_s14, %s1436_s10 }
  0xcb   : > { %2745 = vst [vmem:[#allocation24_spill] sm:$0xff] %v1924_v40  ;;  %s1438_s9 = sshll.u32 %s1226_s15, 2 }
  0xcc   : > { %2747 = vst [vmem:[#allocation26_spill] sm:$0xff] %v1932_v43  ;;  %v496_v45 = vpop.f32.mrf.mxu2  ;;  %v506_v46 = vpop.f32.mrf.mxu3 }
  0xcd   : > { %v1941_v49 = vadd.f32 %v1865_v9, %v496_v45  ;;  %v1944_v50 = vadd.f32 %v1865_v9, %v506_v46  ;;  %v478_v52 = vpop.f32.mrf.mxu0  ;;  %v488_v53 = vpop.f32.mrf.mxu1  ;;  %2764 = vst [vmem:[#allocation43_spill] sm:$0xff] %v2032_v39  ;;  %v2038_v45 = vsel %vm1049_vm1, %v1046_v27, -inf }
  0xce   : > { %v1953_v55 = vadd.f32 %v1865_v9, %v478_v52  ;;  %v1956_v56 = vadd.f32 %v1865_v9, %v488_v53  ;;  %2766 = vst [vmem:[#allocation45_spill] sm:$0xff] %v2038_v45 }
  0xcf   : > { %2749 = vst [vmem:[#allocation28_spill] sm:$0xff] %v1941_v49  ;;  %v1043_v60 = vmax.f32 %v1941_v49, 0.0  ;;  %v1047_v62 = vmax.f32 %v1944_v50, 0.0 }
  0xd0   : > { %2750 = vst [vmem:[#allocation29_spill] sm:$0xff] %v1944_v50  ;;  %v1036_v1 = vmax.f32 %v1953_v55, 0.0  ;;  %579 = vrot.lane.b32.xlu0 %v1950_v54, %s1695_s19  ;;  %v1040_v5 = vmax.f32 %v1956_v56, 0.0 }
  0xd1   : > { %2753 = vst [vmem:[#allocation32_spill] sm:$0xff] %v1953_v55  ;;  %581 = vrot.lane.b32.xlu1 %v1941_v49, %s1695_s19  ;;  %v1987_v6 = vsel %vm1049_vm1, %v1047_v62, -inf  ;;  %v1993_v8 = vsel %vm1049_vm1, %v1043_v60, -inf  ;;  %v1562_v60 = vld [vmem:[%s1863_s11 + $0x1] ss:$0 sm:$0xff] }
  0xd2   : > { %2754 = vst [vmem:[#allocation33_spill] sm:$0xff] %v1956_v56  ;;  %v1990_v7 = vsel %vm1049_vm1, %v1036_v1, -inf  ;;  %v2005_v18 = vsel %vm1049_vm1, %v1040_v5, -inf  ;;  %v1561_v62 = vld [vmem:[%s1863_s11] ss:$0 sm:$0xff]  ;;  %v1697_v1 = vmov 0.0  }
  0xd3   : > { %2757 = vst [vmem:[#allocation36_spill] sm:$0xff] %v1987_v6  ;;  %v2065_v5 = vld [vmem:[%s364_s20] sm:$0x7f] }
  0xd4   : > { %2758 = vst [vmem:[#allocation37_spill] sm:$0xff] %v1990_v7  ;;  %v498_v19 = vpop.f32.mrf.mxu2  ;;  %v508_v21 = vpop.f32.mrf.mxu3  ;;  %v2083_v27 = vperm.slane %v2065_v5, 1  ;;  %v2146_v36 = vperm.slane %v2065_v5, 6 }
  0xd5   : > { %2759 = vst [vmem:[#allocation38_spill] sm:$0xff] %v1993_v8  ;;  %v2011_v25 = vadd.f32 %v1865_v9, %v498_v19  ;;  %v2014_v26 = vadd.f32 %v1865_v9, %v508_v21  ;;  %v2071_v19 = vperm.slane %v2065_v5, 0 }
  0xd6   : > { %2761 = vst [vmem:[#allocation40_spill] sm:$0xff] %v2005_v18 }
  0xd7   : > { %2762 = vst [vmem:[#allocation41_spill] sm:$0xff] %v2011_v25  ;;  %v1044_v35 = vmax.f32 %v2011_v25, 0.0  ;;  %583 = vrot.lane.b32.xlu2 %v2011_v25, %s1695_s19  ;;  %v1048_v9 = vmax.f32 %v2014_v26, 0.0 }
  0xd8   : > { %2763 = vst [vmem:[#allocation42_spill] sm:$0xff] %v2014_v26  ;;  %573 = vrot.lane.b32.xlu0 %v1899_v29, %s1695_s19 }
  0xd9   : > { %567 = vrot.lane.b32.xlu1 %v1953_v55, %s1695_s19  ;;  %v2035_v44 = vsel %vm1049_vm1, %v1044_v35, -inf  ;;  %v2041_v46 = vsel %vm1049_vm1, %v1048_v9, -inf  ;;  %532 = vst.msk [vmem:[#allocation2] sm:$0xff] %vm531_vm2, %v1697_v1 }
  0xda   : > { %2765 = vst [vmem:[#allocation44_spill] sm:$0xff] %v2035_v44 }
  0xdb   : > { %2767 = vst [vmem:[#allocation46_spill] sm:$0xff] %v2041_v46 }
  0xdc   : > { %533 = vst.msk [vmem:[#allocation2 + $0x8] sm:$0xff] %vm531_vm2, %v1697_v1 }
  0xdd   : > { %534 = vst.msk [vmem:[#allocation2 + $0x10] sm:$0xff] %vm531_vm2, %v1697_v1 }
  0xde   : > { %535 = vst.msk [vmem:[#allocation2 + $0x18] sm:$0xff] %vm531_vm2, %v1697_v1 }
  0xdf   : > { %589 = vrot.lane.b32.xlu2 %v1944_v50, %s1695_s19  ;;  %536 = vst.msk [vmem:[#allocation2 + $0x20] sm:$0xff] %vm531_vm2, %v1697_v1 }
  0xe0   : > { %591 = vrot.lane.b32.xlu0 %v2014_v26, %s1695_s19  ;;  %537 = vst.msk [vmem:[#allocation2 + $0x28] sm:$0xff] %vm531_vm2, %v1697_v1  ;;  %v628_v21 = vld [vmem:[#allocation2] sm:$0xff] }
  0xe1   : > { %575 = vrot.lane.b32.xlu1 %v1956_v56, %s1695_s19  ;;  %539 = vst.msk [vmem:[#allocation2 + $0xb0] sm:$0xff] %vm531_vm2, %v1697_v1  ;;  %v645_v35 = vmul.f32 %v2071_v19, %v628_v21 }
  0xe2   : > { %540 = vst.msk [vmem:[#allocation2 + $0xb8] sm:$0xff] %vm531_vm2, %v1697_v1 }
  0xe3   : > { %541 = vst.msk [vmem:[#allocation2 + $0xc0] sm:$0xff] %vm531_vm2, %v1697_v1  ;;  %v664_v11 = vadd.f32 %v2080_v24, %v645_v35 }
  0xe4   : > { %v630_v9 = vld [vmem:[#allocation2 + $0x10] sm:$0xff]  ;;  %542 = vst.msk [vmem:[#allocation2 + $0xc8] sm:$0xff] %vm531_vm2, %v1697_v1 }
  0xe5   : > { %v698_v53 = vmul.f32 %v2083_v27, %v630_v9  ;;  %543 = vst.msk [vmem:[#allocation2 + $0xd0] sm:$0xff] %vm531_vm2, %v1697_v1 }
  0xe6   : > { %v683_v22 = vld [vmem:[#allocation2 + $0x20] sm:$0xff]  ;;  %544 = vst.msk [vmem:[#allocation2 + $0xd8] sm:$0xff] %vm531_vm2, %v1697_v1 }
  0xe7   : > { %1016 = vrot.lane.b32.xlu2 %v1562_v60, %s1696_s16  ;;  %v2089_v60 = vperm.slane %v2065_v5, 2  ;;  %v700_v15 = vmul.f32 %v2083_v27, %v683_v22  ;;  %v714_v42 = vadd.f32 %v698_v53, %v664_v11  ;;  %v649_v30 = vmul.f32 %v683_v22, %v2071_v19  ;;  %v631_v53 = vld [vmem:[#allocation2 + $0x18] sm:$0xff] }
  0xe8   : > { %v648_v61 = vmul.f32 %v2071_v19, %v631_v53 }
  0xe9   : > { %587 = vrot.lane.b32.xlu1 %v1977_v2, %s1695_s19  ;;  %v748_v63 = vmul.f32 %v2089_v60, %v683_v22  ;;  %v2287_v13 = vld [vmem:[#allocation2 + $0xb8] sm:$0xff]  ;;  %s1228_s19 = scalar_lea.hbm %s2672_s6, %s1438_s9 }
  0xea   : > { %v667_v22 = vadd.f32 %v2080_v24, %v648_v61  ;;  %2779 = vst [vmem:[#allocation58_spill] sm:$0xff] %v2287_v13  ;;  %s1231_s24 = sshll.u32 %s1228_s19, 4  ;;  %s1232_s24 = int_to_ptr.hbm [resolvable:$true] %s1231_s24 }
  0xeb   : > { %v764_v14 = vadd.f32 %v748_v63, %v714_v42  ;;  %v699_v42 = vmul.f32 %v2083_v27, %v631_v53  ;;  %v684_v63 = vld [vmem:[#allocation2 + $0x28] sm:$0xff]  ;;  %s1607_s17 = sshra.s32 %s1232_s24, 4  ;;  %s1608_s17 = int_to_ptr.hbm [resolvable:$true] %s1607_s17 }
  0xec   : > { %s1609_s18 = scalar_lea.hbm %s1608_s17, 32  ;;  %p1614_p8 = scmp.lt.s32.totalorder %s1608_s17, %s2672_s6 }
  0xed   : > { %p1610_p5 = scmp.ne.s32.totalorder %s1608_s17, %s1609_s18  ;;  %p1615_p10 = scmp.lt.s32.totalorder %s1613_s29, %s1609_s18 }
  0xef   : > { %p1611_p6 = pnand %p1610_p5, %p1800_p9  ;;  %p1616_p11 = por %p1615_p10, %p1614_p8 }
  0xf1   : > { %996 = vrot.lane.b32.xlu1 %v1561_v62, %s1696_s16  ;;  %v647_v62 = vmul.f32 %v2071_v19, %v630_v9  ;;  %v668_v9 = vadd.f32 %v2080_v24, %v649_v30  ;;  %s1229_s16 = sshll.u32 %s2568_s30, 4  ;;  %p1612_p7 = pneg %p1611_p6  ;;  %s1230_s16 = int_to_ptr.vmem [resolvable:$true] %s1229_s16 }
  0xf3   : > { %v666_v21 = vadd.f32 %v2080_v24, %v647_v62  ;;  %p1617_p13 = pnand %p1616_p11, %p1612_p7 }
  0xf5   : > { %v716_v35 = vadd.f32 %v700_v15, %v666_v21 }
 0x112   : > { %v570_v47 = vpop.permute.xlu2 %569 }
 0x113   : > { %614 = vst.msk [vmem:[#allocation2 + $0x50] sm:$0xff] %vm531_vm2, %v570_v47  ;;  %v629_v47 = vld [vmem:[#allocation2 + $0x8] sm:$0xff] }
 0x114   : > { %v646_v11 = vmul.f32 %v2071_v19, %v629_v47  ;;  %v650_v47 = vmul.f32 %v684_v63, %v2071_v19 }
 0x116   : > { %v665_v15 = vadd.f32 %v2080_v24, %v646_v11  ;;  %v669_v11 = vadd.f32 %v2080_v24, %v650_v47 }
 0x118   : > { %v715_v21 = vadd.f32 %v699_v42, %v665_v15  ;;  %v2130_v42 = vperm.slane %v2065_v5, 3 }
 0x11a   : > { %v578_v52 = vpop.permute.xlu2 %577  ;;  %v832_v37 = vld [vmem:[#allocation2 + $0x50] sm:$0xff] }
 0x11b   : > { %618 = vst.msk [vmem:[#allocation2 + $0x70] sm:$0xff] %vm531_vm2, %v578_v52  ;;  %v655_v1 = vmul.f32 %v832_v37, %v2071_v19  ;;  %v701_v52 = vmul.f32 %v2083_v27, %v684_v63 }
 0x11d   : > { %v2105_v62 = vadd.f32 %v2080_v24, %v655_v1  ;;  %v749_v1 = vmul.f32 %v2089_v60, %v684_v63  ;;  %v717_v59 = vadd.f32 %v701_v52, %v667_v22 }
 0x11f   : > { %v765_v0 = vadd.f32 %v749_v1, %v715_v21 }
 0x122   : > { %v572_v30 = vpop.permute.xlu2 %571  ;;  %v932_v34 = vld [vmem:[#allocation2 + $0x70] sm:$0xff] }
 0x123   : > { %615 = vst.msk [vmem:[#allocation2 + $0x58] sm:$0xff] %vm531_vm2, %v572_v30  ;;  %v659_v53 = vmul.f32 %v932_v34, %v2071_v19  ;;  %v2169_v6 = vmul.f32 %v932_v34, %v2130_v42  ;;  %v2172_v51 = vmul.f32 %v932_v34, %v2083_v27 }
 0x125   : > { %v2119_v3 = vadd.f32 %v2080_v24, %v659_v53  ;;  %2768 = vst [vmem:[#allocation47_spill] sm:$0xff] %v2172_v51 }
 0x12a   : > { %v562_v30 = vpop.permute.xlu0 %561  ;;  %v2121_v33 = vld [vmem:[#allocation2 + $0x58] sm:$0xff] }
 0x12b   : > { %610 = vst.msk [vmem:[#allocation2 + $0x30] sm:$0xff] %vm531_vm2, %v562_v30  ;;  %v656_v61 = vmul.f32 %v2121_v33, %v2071_v19 }
 0x12d   : > { %v2127_v15 = vadd.f32 %v2080_v24, %v656_v61 }
 0x131   : > { %v584_v63 = vpop.permute.xlu2 %583 }
 0x132   : > { %621 = vst.msk [vmem:[#allocation2 + $0x88] sm:$0xff] %vm531_vm2, %v584_v63  ;;  %v586_v22 = vpop.permute.xlu0 %585  ;;  %v733_v52 = vld [vmem:[#allocation2 + $0x30] sm:$0xff] }
 0x133   : > { %622 = vst.msk [vmem:[#allocation2 + $0x90] sm:$0xff] %vm531_vm2, %v586_v22  ;;  %v750_v21 = vmul.f32 %v2089_v60, %v733_v52  ;;  %v797_v1 = vmul.f32 %v2130_v42, %v733_v52  ;;  %v651_v47 = vmul.f32 %v733_v52, %v2071_v19  ;;  %v702_v53 = vmul.f32 %v733_v52, %v2083_v27 }
 0x134   : > { %v2143_v22 = vperm.slane %v2065_v5, 4  ;;  %v801_v52 = vmul.f32 %v832_v37, %v2130_v42 }
 0x135   : > { %v766_v30 = vadd.f32 %v750_v21, %v716_v35  ;;  %v813_v61 = vadd.f32 %v797_v1, %v764_v14  ;;  %v670_v31 = vadd.f32 %v2080_v24, %v651_v47  ;;  %v718_v32 = vadd.f32 %v702_v53, %v668_v9 }
 0x136   : > { %v2149_v14 = vperm.slane %v2065_v5, 5  ;;  %v849_v35 = vmul.f32 %v2143_v22, %v832_v37  ;;  %v2159_v21 = vmul.f32 %v932_v34, %v2143_v22  ;;  %v706_v1 = vmul.f32 %v832_v37, %v2083_v27 }
 0x137   : > { %v2195_v44 = vmul.f32 %v2143_v22, %v2121_v33 }
 0x138   : > { %v897_v9 = vmul.f32 %v2149_v14, %v832_v37  ;;  %v2163_v5 = vmul.f32 %v932_v34, %v2149_v14 }
 0x139   : > { %v590_v58 = vpop.permute.xlu2 %589  ;;  %v887_v57 = vld [vmem:[#allocation2 + $0x88] sm:$0xff] }
 0x13a   : > { %v564_v4 = vpop.permute.xlu0 %563  ;;  %624 = vst.msk [vmem:[#allocation2 + $0xa0] sm:$0xff] %vm531_vm2, %v590_v58  ;;  %v754_v58 = vmul.f32 %v832_v37, %v2089_v60  ;;  %v2253_v39 = vmul.f32 %v887_v57, %v2089_v60 }
 0x13b   : > { %611 = vst.msk [vmem:[#allocation2 + $0x38] sm:$0xff] %vm531_vm2, %v564_v4  ;;  %v566_v63 = vpop.permute.xlu1 %565  ;;  %v2155_v4 = vmul.f32 %v2146_v36, %v932_v34 }
 0x13c   : > { %612 = vst.msk [vmem:[#allocation2 + $0x40] sm:$0xff] %vm531_vm2, %v566_v63  ;;  %v2166_v63 = vmul.f32 %v932_v34, %v2089_v60 }
 0x13d   : > { %2772 = vst [vmem:[#allocation51_spill] sm:$0xff] %v2253_v39 }
 0x142   : > { %v580_v47 = vpop.permute.xlu0 %579  ;;  %v734_v53 = vld [vmem:[#allocation2 + $0x38] sm:$0xff] }
 0x143   : > { %619 = vst.msk [vmem:[#allocation2 + $0x78] sm:$0xff] %vm531_vm2, %v580_v47  ;;  %v582_v46 = vpop.permute.xlu1 %581  ;;  %v751_v45 = vmul.f32 %v2089_v60, %v734_v53  ;;  %v782_v37 = vld [vmem:[#allocation2 + $0x40] sm:$0xff]  ;;  %v798_v43 = vmul.f32 %v2130_v42, %v734_v53  ;;  %v652_v41 = vmul.f32 %v734_v53, %v2071_v19  ;;  %v703_v18 = vmul.f32 %v734_v53, %v2083_v27 }
 0x144   : > { %620 = vst.msk [vmem:[#allocation2 + $0x80] sm:$0xff] %vm531_vm2, %v582_v46  ;;  %v799_v10 = vmul.f32 %v2130_v42, %v782_v37  ;;  %v847_v7 = vmul.f32 %v2143_v22, %v782_v37  ;;  %v704_v34 = vmul.f32 %v782_v37, %v2083_v27  ;;  %v752_v47 = vmul.f32 %v782_v37, %v2089_v60 }
 0x145   : > { %v2184_v48 = vadd.f32 %v751_v45, %v717_v59  ;;  %v2186_v40 = vadd.f32 %v798_v43, %v765_v0  ;;  %v2189_v38 = vadd.f32 %v2080_v24, %v652_v41  ;;  %v2191_v23 = vadd.f32 %v703_v18, %v669_v11  ;;  %v936_v41 = vld [vmem:[#allocation2 + $0x90] sm:$0xff] }
 0x146   : > { %v815_v53 = vadd.f32 %v799_v10, %v766_v30  ;;  %v863_v12 = vadd.f32 %v847_v7, %v813_v61  ;;  %v720_v46 = vadd.f32 %v704_v34, %v670_v31  ;;  %v768_v8 = vadd.f32 %v752_v47, %v718_v32  ;;  %v890_v61 = vld [vmem:[#allocation2 + $0xa0] sm:$0xff] }
 0x147   : > { %v2199_v59 = vmul.f32 %v2149_v14, %v2121_v33  ;;  %v2203_v43 = vmul.f32 %v2121_v33, %v2089_v60  ;;  %v653_v0 = vmul.f32 %v782_v37, %v2071_v19  ;;  %v2216_v32 = vmul.f32 %v2121_v33, %v2130_v42 }
 0x148   : > { %v2206_v10 = vadd.f32 %v849_v35, %v815_v53  ;;  %v2208_v31 = vadd.f32 %v897_v9, %v863_v12  ;;  %v2210_v7 = vadd.f32 %v754_v58, %v720_v46  ;;  %v2212_v18 = vadd.f32 %v801_v52, %v768_v8 }
 0x149   : > { %v2219_v45 = vmul.f32 %v2149_v14, %v887_v57  ;;  %v672_v11 = vadd.f32 %v2080_v24, %v653_v0  ;;  %v2224_v30 = vmul.f32 %v2121_v33, %v2083_v27  ;;  %v2227_v9 = vmul.f32 %v2146_v36, %v887_v57 }
 0x14a   : > { %v574_v12 = vpop.permute.xlu0 %573  ;;  %v933_v35 = vld [vmem:[#allocation2 + $0x78] sm:$0xff]  ;;  %v2230_v8 = vmul.f32 %v2146_v36, %v936_v41  ;;  %v2233_v58 = vmul.f32 %v887_v57, %v2130_v42  ;;  %v2236_v52 = vmul.f32 %v887_v57, %v2143_v22  ;;  %v2242_v47 = vmul.f32 %v936_v41, %v2143_v22 }
 0x14b   : > { %616 = vst.msk [vmem:[#allocation2 + $0x60] sm:$0xff] %vm531_vm2, %v574_v12  ;;  %v568_v37 = vpop.permute.xlu1 %567  ;;  %v886_v33 = vld [vmem:[#allocation2 + $0x80] sm:$0xff]  ;;  %v2239_v34 = vadd.f32 %v706_v1, %v672_v11  ;;  %v2245_v53 = vmul.f32 %v936_v41, %v2149_v14  ;;  %v713_v46 = vmul.f32 %v887_v57, %v2083_v27  ;;  %v2250_v0 = vmul.f32 %v2149_v14, %v890_v61  ;;  %v2259_v11 = vld [vmem:[#allocation2 + $0xb0] sm:$0xff] }
 0x14c   : > { %2769 = vst [vmem:[#allocation48_spill] sm:$0xff] %v2236_v52  ;;  %v762_v12 = vmul.f32 %v936_v41, %v2089_v60  ;;  %v2257_v1 = vmul.f32 %v936_v41, %v2130_v42  ;;  %v2262_v26 = vmul.f32 %v2146_v36, %v890_v61  ;;  %v660_v50 = vmul.f32 %v933_v35, %v2071_v19 }
 0x14d   : > { %2770 = vst [vmem:[#allocation49_spill] sm:$0xff] %v2245_v53  ;;  %v2269_v2 = vmul.f32 %v890_v61, %v2143_v22  ;;  %v2272_v57 = vmul.f32 %v2146_v36, %v933_v35  ;;  %v2275_v17 = vmul.f32 %v933_v35, %v2143_v22  ;;  %v2279_v41 = vmul.f32 %v2146_v36, %v2259_v11 }
 0x14e   : > { %613 = vst.msk [vmem:[#allocation2 + $0x48] sm:$0xff] %vm531_vm2, %v568_v37  ;;  %v2266_v37 = vmul.f32 %v890_v61, %v2130_v42  ;;  %v712_v55 = vmul.f32 %v886_v33, %v2083_v27  ;;  %v2283_v20 = vmul.f32 %v933_v35, %v2149_v14  ;;  %v903_v28 = vmul.f32 %v2149_v14, %v886_v33 }
 0x14f   : > { %2771 = vst [vmem:[#allocation50_spill] sm:$0xff] %v2250_v0  ;;  %v951_v61 = vmul.f32 %v2146_v36, %v886_v33  ;;  %v679_v25 = vadd.f32 %v2080_v24, %v660_v50  ;;  %v2291_v49 = vmul.f32 %v933_v35, %v2089_v60  ;;  %v2294_v56 = vmul.f32 %v933_v35, %v2130_v42 }
 0x150   : > { %2773 = vst [vmem:[#allocation52_spill] sm:$0xff] %v2257_v1  ;;  %v2297_v54 = vmul.f32 %v886_v33, %v2130_v42  ;;  %v728_v29 = vadd.f32 %v712_v55, %v2119_v3  ;;  %v2301_v16 = vmul.f32 %v886_v33, %v2143_v22  ;;  %v2309_v50 = vmul.f32 %v886_v33, %v2089_v60  ;;  %v2311_v1 = vld [vmem:[#allocation2 + $0xc0] sm:$0xff] }
 0x151   : > { %2774 = vst [vmem:[#allocation53_spill] sm:$0xff] %v2259_v11  ;;  %v2321_v3 = vmul.f32 %v2259_v11, %v2143_v22 }
 0x152   : > { %2775 = vst [vmem:[#allocation54_spill] sm:$0xff] %v2262_v26  ;;  %v592_v39 = vpop.permute.xlu0 %591  ;;  %v882_v51 = vld [vmem:[#allocation2 + $0x60] sm:$0xff]  ;;  %v2317_v55 = vadd.f32 %v762_v12, %v728_v29 }
 0x153   : > { %2776 = vst [vmem:[#allocation55_spill] sm:$0xff] %v2266_v37  ;;  %v2306_v37 = vadd.f32 %v713_v46, %v679_v25  ;;  %v2325_v25 = vmul.f32 %v2149_v14, %v2311_v1  ;;  %v899_v46 = vmul.f32 %v2149_v14, %v882_v51  ;;  %v851_v29 = vmul.f32 %v882_v51, %v2143_v22 }
 0x154   : > { %2777 = vst [vmem:[#allocation56_spill] sm:$0xff] %v2269_v2  ;;  %v2304_v2 = vmul.f32 %v933_v35, %v2083_v27  ;;  %v576_v35 = vpop.permute.xlu1 %575 }
 0x155   : > { %2778 = vst [vmem:[#allocation57_spill] sm:$0xff] %v2279_v41  ;;  %v2315_v41 = vmul.f32 %v2146_v36, %v2287_v13  ;;  %v783_v33 = vld [vmem:[#allocation2 + $0x48] sm:$0xff]  ;;  %v803_v13 = vmul.f32 %v882_v51, %v2130_v42 }
 0x156   : > { %2780 = vst [vmem:[#allocation59_spill] sm:$0xff] %v2304_v2  ;;  %v800_v12 = vmul.f32 %v2130_v42, %v783_v33  ;;  %v867_v2 = vadd.f32 %v851_v29, %v2212_v18 }
 0x157   : > { %2781 = vst [vmem:[#allocation60_spill] sm:$0xff] %v2306_v37 }
 0x158   : > { %2782 = vst [vmem:[#allocation61_spill] sm:$0xff] %v2309_v50  ;;  %v947_v50 = vmul.f32 %v2146_v36, %v882_v51  ;;  %v816_v37 = vadd.f32 %v800_v12, %v2184_v48 }
 0x159   : > { %2783 = vst [vmem:[#allocation62_spill] sm:$0xff] %v2311_v1  ;;  %v753_v1 = vmul.f32 %v783_v33, %v2089_v60 }
 0x15a   : > { %2784 = vst [vmem:[#allocation63_spill] sm:$0xff] %v2315_v41  ;;  %v963_v11 = vadd.f32 %v947_v50, %v2208_v31  ;;  %v866_v31 = vadd.f32 %v2195_v44, %v816_v37  ;;  %v2359_v44 = vmul.f32 %v882_v51, %v2071_v19 }
 0x15b   : > { %2785 = vst [vmem:[#allocation64_spill] sm:$0xff] %v2317_v55  ;;  %v819_v55 = vadd.f32 %v803_v13, %v2210_v7  ;;  %v769_v26 = vadd.f32 %v753_v1, %v2191_v23  ;;  %v708_v1 = vmul.f32 %v882_v51, %v2083_v27 }
 0x15c   : > { %2786 = vst [vmem:[#allocation65_spill] sm:$0xff] %v2321_v3  ;;  %v848_v3 = vmul.f32 %v2143_v22, %v783_v33  ;;  %v1074_v53 = vmax.f32 %v963_v11, 0.0 }
 0x15d   : > { %2787 = vst [vmem:[#allocation66_spill] sm:$0xff] %v2325_v25  ;;  %v705_v25 = vmul.f32 %v783_v33, %v2083_v27  ;;  %v869_v52 = vadd.f32 %v2159_v21, %v819_v55  ;;  %v818_v48 = vadd.f32 %v2216_v32, %v769_v26  ;;  %v756_v21 = vmul.f32 %v882_v51, %v2089_v60 }
 0x15e   : > { %625 = vst.msk [vmem:[#allocation2 + $0xa8] sm:$0xff] %vm531_vm2, %v592_v39  ;;  %v915_v39 = vadd.f32 %v899_v46, %v2206_v10  ;;  %v917_v10 = vadd.f32 %v2163_v5, %v867_v2  ;;  %v588_v5 = vpop.permute.xlu1 %587  ;;  %v724_v29 = vadd.f32 %v708_v1, %v2105_v62 }
 0x15f   : > { %617 = vst.msk [vmem:[#allocation2 + $0x68] sm:$0xff] %vm531_vm2, %v576_v35  ;;  %v864_v35 = vadd.f32 %v848_v3, %v2186_v40  ;;  %v721_v41 = vadd.f32 %v705_v25, %v2189_v38  ;;  %v1090_v38 = vsel %vm531_vm2, %v1074_v53, -inf  ;;  %v919_v18 = vadd.f32 %v903_v28, %v869_v52 }
 0x160   : > { %v965_v0 = vadd.f32 %v2155_v4, %v915_v39  ;;  %v967_v23 = vadd.f32 %v951_v61, %v917_v10  ;;  %v654_v4 = vmul.f32 %v783_v33, %v2071_v19  ;;  %623 = vst.msk [vmem:[#allocation2 + $0x98] sm:$0xff] %vm531_vm2, %v588_v5 }
 0x161   : > { %v914_v13 = vadd.f32 %v2199_v59, %v864_v35  ;;  %v771_v7 = vadd.f32 %v2203_v43, %v721_v41  ;;  %v969_v43 = vadd.f32 %v2230_v8, %v919_v18 }
 0x162   : > { %v1076_v40 = vmax.f32 %v965_v0, 0.0  ;;  %v1078_v28 = vmax.f32 %v967_v23, 0.0  ;;  %v673_v41 = vadd.f32 %v2080_v24, %v654_v4 }
 0x163   : > { %v1080_v8 = vmax.f32 %v969_v43, 0.0 }
 0x164   : > { %v1091_v26 = vsel %vm531_vm2, %v1076_v40, -inf  ;;  %v2377_v37 = vsel %vm531_vm2, %v1078_v28, -inf  ;;  %v723_v46 = vadd.f32 %v2224_v30, %v673_v41  ;;  %v2788_v28 = vld [vmem:[#allocation48_spill] sm:$0xff] }
 0x165   : > { %v2356_v2 = vld [vmem:[#allocation2 + $0xa8] sm:$0xff]  ;;  %v1092_v53 = vmax.f32 %v1090_v38, %v1091_v26  ;;  %v1097_v33 = vsel %vm531_vm2, %v1080_v8, -inf  ;;  %v2790_v8 = vld [vmem:[#allocation50_spill] sm:$0xff] }
 0x166   : > { %v2361_v59 = vld [vmem:[#allocation2 + $0x68] sm:$0xff]  ;;  %v908_v32 = vmul.f32 %v2149_v14, %v2356_v2  ;;  %v1098_v10 = vmax.f32 %v2377_v37, %v1097_v33  ;;  %v676_v37 = vadd.f32 %v2080_v24, %v2359_v44 }
 0x167   : > { %v900_v52 = vmul.f32 %v2149_v14, %v2361_v59  ;;  %v948_v51 = vmul.f32 %v2146_v36, %v2361_v59  ;;  %v804_v0 = vmul.f32 %v2361_v59, %v2130_v42  ;;  %v852_v11 = vmul.f32 %v2361_v59, %v2143_v22  ;;  %v937_v40 = vld [vmem:[#allocation2 + $0x98] sm:$0xff] }
 0x168   : > { %v709_v3 = vmul.f32 %v2361_v59, %v2083_v27  ;;  %v757_v27 = vmul.f32 %v2361_v59, %v2089_v60  ;;  %v954_v23 = vmul.f32 %v2146_v36, %v937_v40  ;;  %v858_v4 = vmul.f32 %v937_v40, %v2143_v22 }
 0x169   : > { %v916_v61 = vadd.f32 %v900_v52, %v866_v31  ;;  %v964_v50 = vadd.f32 %v948_v51, %v914_v13  ;;  %v820_v55 = vadd.f32 %v804_v0, %v771_v7  ;;  %v868_v25 = vadd.f32 %v852_v11, %v818_v48  ;;  %v2789_v0 = vld [vmem:[#allocation49_spill] sm:$0xff] }
 0x16a   : > { %v725_v13 = vadd.f32 %v709_v3, %v2127_v15  ;;  %v772_v7 = vadd.f32 %v756_v21, %v2239_v34  ;;  %v773_v38 = vadd.f32 %v757_v27, %v723_v46 }
 0x16b   : > { %v966_v12 = vadd.f32 %v2272_v57, %v916_v61  ;;  %v1075_v39 = vmax.f32 %v964_v50, 0.0  ;;  %v870_v35 = vadd.f32 %v2275_v17, %v820_v55  ;;  %v918_v31 = vadd.f32 %v2283_v20, %v868_v25  ;;  %v2791_v61 = vld [vmem:[#allocation54_spill] sm:$0xff]  ;;  %v2792_v55 = vld [vmem:[#allocation57_spill] sm:$0xff] }
 0x16c   : > { %v774_v57 = vadd.f32 %v2166_v63, %v724_v29  ;;  %v775_v20 = vadd.f32 %v2291_v49, %v725_v13  ;;  %v821_v15 = vadd.f32 %v2169_v6, %v772_v7  ;;  %v822_v63 = vadd.f32 %v2294_v56, %v773_v38  ;;  %v2793_v29 = vld [vmem:[#allocation63_spill] sm:$0xff] }
 0x16d   : > { %v1077_v48 = vmax.f32 %v966_v12, 0.0  ;;  %v1093_v30 = vsel %vm531_vm2, %v1075_v39, -inf  ;;  %v920_v62 = vadd.f32 %v2219_v45, %v870_v35  ;;  %v968_v17 = vadd.f32 %v2227_v9, %v918_v31  ;;  %v2795_v31 = vld [vmem:[#allocation60_spill] sm:$0xff] }
 0x16e   : > { %v823_v34 = vadd.f32 %v2297_v54, %v774_v57  ;;  %v824_v21 = vadd.f32 %v2233_v58, %v775_v20  ;;  %v871_v5 = vadd.f32 %v2301_v16, %v821_v15  ;;  %v906_v6 = vmul.f32 %v937_v40, %v2149_v14  ;;  %v2797_v57 = vld [vmem:[#allocation61_spill] sm:$0xff] }
 0x16f   : > { %v1094_v18 = vsel %vm531_vm2, %v1077_v48, -inf  ;;  %v1079_v45 = vmax.f32 %v968_v17, 0.0  ;;  %v970_v9 = vadd.f32 %v954_v23, %v920_v62  ;;  %v872_v54 = vadd.f32 %v2788_v28, %v822_v63  ;;  %v2796_v48 = vld [vmem:[#allocation59_spill] sm:$0xff] }
 0x170   : > { %v1095_v1 = vmax.f32 %v1093_v30, %v1094_v18  ;;  %v873_v49 = vadd.f32 %v2242_v47, %v823_v34  ;;  %v874_v52 = vadd.f32 %v858_v4, %v824_v21  ;;  %v921_v11 = vadd.f32 %v2789_v0, %v871_v5  ;;  %v2799_v4 = vld [vmem:[#allocation52_spill] sm:$0xff]  ;;  %v2801_v63 = vld [vmem:[#allocation55_spill] sm:$0xff] }
 0x171   : > { %v1099_v43 = vsel %vm531_vm2, %v1079_v45, -inf  ;;  %v1081_v51 = vmax.f32 %v970_v9, 0.0  ;;  %v956_v58 = vmul.f32 %v2146_v36, %v2356_v2  ;;  %v922_v16 = vadd.f32 %v906_v6, %v872_v54  ;;  %v2800_v45 = vld [vmem:[#allocation64_spill] sm:$0xff] }
 0x172   : > { %v1539_v26 = vpack.i.bf16 %v1095_v1, %v1092_v53  ;;  %v923_v56 = vadd.f32 %v2790_v8, %v873_v49  ;;  %v924_v47 = vadd.f32 %v908_v32, %v874_v52  ;;  %v658_v53 = vmul.f32 %v2361_v59, %v2071_v19  ;;  %v2794_v19 = vld [vmem:[#allocation47_spill] sm:$0xff]  ;;  %v895_v9 = vld [vmem:[#allocation2 + $0xc8] sm:$0xff]  ;;  %v2802_v49 = vld [vmem:[#allocation58_spill] sm:$0xff] }
 0x173   : > { %v1100_v41 = vsel %vm531_vm2, %v1081_v51, -inf  ;;  %v971_v50 = vadd.f32 %v2791_v61, %v921_v11  ;;  %v763_v25 = vmul.f32 %v937_v40, %v2089_v60  ;;  %v972_v46 = vadd.f32 %v956_v58, %v922_v16  ;;  %v2804_v52 = vld [vmem:[#allocation56_spill] sm:$0xff]  ;;  %v2805_v51 = vld [vmem:[#allocation65_spill] sm:$0xff]  ;;  %v945_v8 = vld [vmem:[#allocation2 + $0xd8] sm:$0xff] }
 0x174   : > { %1540 = vrot.lane.b32.xlu0 %v1539_v26, %s1698_s21  ;;  %v973_v3 = vadd.f32 %v2792_v55, %v923_v56  ;;  %v1101_v33 = vmax.f32 %v1099_v43, %v1100_v41  ;;  %v974_v12 = vadd.f32 %v2793_v29, %v924_v47  ;;  %v677_v32 = vadd.f32 %v2080_v24, %v658_v53  ;;  %v2803_v26 = vld [vmem:[#allocation53_spill] sm:$0xff]  ;;  %v2449_v56 = vpop.permute.xlu1 %996  ;;  %v2807_v41 = vld [vmem:[#allocation66_spill] sm:$0xff]  ;;  %v2459_v55 = vpop.permute.xlu2 %1016 }
 0x175   : > { %v1082_v39 = vmax.f32 %v971_v50, 0.0  ;;  %v726_v59 = vadd.f32 %v2794_v19, %v676_v37  ;;  %v779_v44 = vadd.f32 %v763_v25, %v2795_v31  ;;  %v1083_v27 = vmax.f32 %v972_v46, 0.0  ;;  %v944_v11 = vld [vmem:[#allocation2 + $0xd0] sm:$0xff] }
 0x176   : > { %v1084_v35 = vmax.f32 %v973_v3, 0.0  ;;  %v1544_v13 = vpack.i.bf16 %v1101_v33, %v1098_v10  ;;  %v1085_v7 = vmax.f32 %v974_v12, 0.0  ;;  %v727_v30 = vadd.f32 %v2796_v48, %v677_v32  ;;  %v2798_v10 = vld [vmem:[#allocation51_spill] sm:$0xff]  ;;  %v2808_v29 = vld [vmem:[#allocation17_spill] sm:$0xff]  ;;  %v2809_v12 = vld [vmem:[#allocation22_spill] sm:$0xff] }
 0x177   : > { %v1102_v62 = vsel %vm531_vm2, %v1082_v39, -inf  ;;  %v776_v17 = vadd.f32 %v2797_v57, %v726_v59  ;;  %v810_v38 = vmul.f32 %v937_v40, %v2130_v42  ;;  %v1105_v20 = vsel %vm531_vm2, %v1083_v27, -inf  ;;  %v2811_v59 = vld [vmem:[#allocation31_spill] sm:$0xff]  ;;  %v2812_v31 = vld [vmem:[#allocation33_spill] sm:$0xff]  ;;  %v2814_v27 = vld [vmem:[#allocation28_spill] sm:$0xff] }
 0x178   : > { %v1103_v60 = vsel %vm531_vm2, %v1084_v35, -inf  ;;  %1545 = vrot.lane.b32.xlu1 %v1544_v13, %s1698_s21  ;;  %v1106_v15 = vsel %vm531_vm2, %v1085_v7, -inf  ;;  %v777_v18 = vadd.f32 %v2798_v10, %v727_v30  ;;  %v812_v34 = vmul.f32 %v2356_v2, %v2130_v42 }
 0x179   : > { %v1104_v24 = vmax.f32 %v1102_v62, %v1103_v60  ;;  %v1107_v23 = vmax.f32 %v1105_v20, %v1106_v15  ;;  %v825_v1 = vadd.f32 %v2799_v4, %v776_v17  ;;  %v827_v21 = vadd.f32 %v2801_v63, %v2800_v45  ;;  %v2816_v62 = vld [vmem:[#allocation41_spill] sm:$0xff] }
 0x17a   : > { %v826_v40 = vadd.f32 %v810_v38, %v777_v18  ;;  %v860_v5 = vmul.f32 %v2356_v2, %v2143_v22  ;;  %v862_v6 = vmul.f32 %v2802_v49, %v2143_v22  ;;  %v909_v43 = vmul.f32 %v2803_v26, %v2149_v14  ;;  %v2806_v22 = vld [vmem:[#allocation62_spill] sm:$0xff] }
 0x17b   : > { %v1549_v28 = vpack.i.bf16 %v1107_v23, %v1104_v24  ;;  %v828_v54 = vadd.f32 %v812_v34, %v779_v44  ;;  %v875_v42 = vadd.f32 %v2804_v52, %v825_v1  ;;  %v877_v0 = vadd.f32 %v2805_v51, %v827_v21  ;;  %v2819_v52 = vld [vmem:[#allocation21_spill] sm:$0xff] }
 0x17c   : > { %v876_v58 = vadd.f32 %v860_v5, %v826_v40  ;;  %v910_v2 = vmul.f32 %v2802_v49, %v2149_v14  ;;  %v912_v16 = vmul.f32 %v2149_v14, %v895_v9  ;;  %v959_v47 = vmul.f32 %v2146_v36, %v2806_v22 }
 0x17d   : > { %1550 = vrot.lane.b32.xlu2 %v1549_v28, %s1698_s21  ;;  %v878_v53 = vadd.f32 %v862_v6, %v828_v54  ;;  %v925_v37 = vadd.f32 %v909_v43, %v875_v42  ;;  %v927_v61 = vadd.f32 %v2807_v41, %v877_v0  ;;  %v960_v50 = vmul.f32 %v2146_v36, %v895_v9  ;;  %v2818_v54 = vld [vmem:[#allocation16_spill] sm:$0xff] }
 0x17e   : > { %v926_v3 = vadd.f32 %v910_v2, %v876_v58  ;;  %v961_v25 = vmul.f32 %v2146_v36, %v944_v11  ;;  %v962_v33 = vmul.f32 %v2146_v36, %v945_v8  ;;  %v2810_v32 = vmax.f32 %v2808_v29, %v2809_v12  ;;  %v2822_v2 = vld [vmem:[#allocation19_spill] sm:$0xff] }
 0x17f   : > { %v928_v46 = vadd.f32 %v912_v16, %v878_v53  ;;  %v975_v14 = vadd.f32 %v959_v47, %v925_v37  ;;  %v2813_v44 = vmax.f32 %v2811_v59, %v2812_v31  ;;  %v2815_v7 = vmax.f32 %v2814_v27, %v2808_v29  ;;  %v2824_v53 = vld [vmem:[#allocation32_spill] sm:$0xff] }
 0x180   : > { %v1005_v39 = vmul.f32 %v2449_v56, %v2810_v32  ;;  %v976_v35 = vadd.f32 %v960_v50, %v926_v3  ;;  %v977_v19 = vadd.f32 %v961_v25, %v927_v61  ;;  %v2817_v60 = vmax.f32 %v2816_v62, %v2811_v59  ;;  %v2826_v50 = vld [vmem:[#allocation18_spill] sm:$0xff] }
 0x181   : > { %v1006_v13 = vmul.f32 %v2449_v56, %v2813_v44  ;;  %v1007_v36 = vmul.f32 %v2449_v56, %v2815_v7  ;;  %v978_v48 = vadd.f32 %v962_v33, %v928_v46  ;;  %v1086_v30 = vmax.f32 %v975_v14, 0.0  ;;  %v2828_v33 = vld [vmem:[#allocation35_spill] sm:$0xff] }
 0x182   : > { %v1008_v57 = vmul.f32 %v2449_v56, %v2817_v60  ;;  %v1025_v17 = vadd.f32 %v2459_v55, %v1005_v39  ;;  %v1087_v38 = vmax.f32 %v976_v35, 0.0  ;;  %v1088_v24 = vmax.f32 %v977_v19, 0.0  ;;  %v2830_v35 = vld [vmem:[#allocation29_spill] sm:$0xff] }
 0x183   : > { %v1026_v20 = vadd.f32 %v2459_v55, %v1006_v13  ;;  %v1027_v15 = vadd.f32 %v2459_v55, %v1007_v36  ;;  %v1089_v10 = vmax.f32 %v978_v48, 0.0  ;;  %v1108_v18 = vsel %vm531_vm2, %v1086_v30, -inf }
 0x184   : > { %v1028_v23 = vadd.f32 %v2459_v55, %v1008_v57  ;;  %v1120_v34 = vmax.f32 %v1025_v17, 0.0  ;;  %v1109_v4 = vsel %vm531_vm2, %v1088_v24, -inf  ;;  %v1111_v1 = vsel %vm531_vm2, %v1087_v38, -inf }
 0x185   : > { %v1121_v45 = vmax.f32 %v1026_v20, 0.0  ;;  %v1122_v63 = vmax.f32 %v1027_v15, 0.0  ;;  %v1110_v21 = vmax.f32 %v1108_v18, %v1109_v4  ;;  %v1112_v9 = vsel %vm531_vm2, %v1089_v10, -inf }
 0x186   : > { %v1123_v40 = vmax.f32 %v1028_v23, 0.0  ;;  %v1137_v5 = vsel %vm1128_vm3, %v1120_v34, -inf  ;;  %v1113_v49 = vmax.f32 %v1111_v1, %v1112_v9  ;;  %v2820_v42 = vmax.f32 %v2818_v54, %v2819_v52 }
 0x187   : > { %v1138_v6 = vsel %vm1128_vm3, %v1122_v63, -inf  ;;  %v1140_v26 = vsel %vm1128_vm3, %v1121_v45, -inf  ;;  %v2821_v8 = vmax.f32 %v2809_v12, %v2818_v54  ;;  %v2823_v16 = vmax.f32 %v2812_v31, %v2822_v2  ;;  %v2832_v31 = vld [vmem:[#allocation42_spill] sm:$0xff] }
 0x188   : > { %v1139_v43 = vmax.f32 %v1137_v5, %v1138_v6  ;;  %v1141_v28 = vsel %vm1128_vm3, %v1123_v40, -inf  ;;  %v1001_v51 = vmul.f32 %v2449_v56, %v2820_v42  ;;  %v1554_v0 = vpack.i.bf16 %v1113_v49, %v1110_v21  ;;  %v2834_v49 = vld [vmem:[#allocation43_spill] sm:$0xff]  ;;  %v2835_v6 = vld [vmem:[#allocation44_spill] sm:$0xff]  ;;  %v2837_v54 = vld [vmem:[#allocation34_spill] sm:$0xff] }
 0x189   : > { %v1142_v11 = vmax.f32 %v1140_v26, %v1141_v28  ;;  %v1003_v58 = vmul.f32 %v2449_v56, %v2821_v8  ;;  %v1004_v22 = vmul.f32 %v2449_v56, %v2823_v16  ;;  %v2825_v37 = vmax.f32 %v2822_v2, %v2824_v53  ;;  %v2838_v42 = vld [vmem:[#allocation38_spill] sm:$0xff]  ;;  %v2840_v2 = vld [vmem:[#allocation15_spill] sm:$0xff] }
 0x18a   : > { %v1021_v47 = vadd.f32 %v2459_v55, %v1001_v51  ;;  %1555 = vrot.lane.b32.xlu0 %v1554_v0, %s1698_s21  ;;  %v2827_v3 = vmax.f32 %v2826_v50, %v2814_v27  ;;  %v2829_v46 = vmax.f32 %v2828_v33, %v2816_v62  ;;  %v2831_v19 = vmax.f32 %v2830_v35, %v2826_v50  ;;  %v2848_v35 = vld [vmem:[#allocation37_spill] sm:$0xff] }
 0x18b   : > { %v1002_v41 = vmul.f32 %v2449_v56, %v2825_v37  ;;  %v1023_v61 = vadd.f32 %v2459_v55, %v1003_v58  ;;  %v1024_v29 = vadd.f32 %v2459_v55, %v1004_v22  ;;  %v2833_v44 = vmax.f32 %v2832_v31, %v2828_v33 }
 0x18c   : > { %v1009_v25 = vmul.f32 %v2449_v56, %v2827_v3  ;;  %v1010_v14 = vmul.f32 %v2449_v56, %v2829_v46  ;;  %v1116_v12 = vmax.f32 %v1021_v47, 0.0  ;;  %v1011_v59 = vmul.f32 %v2449_v56, %v2831_v19  ;;  %v2842_v47 = vld [vmem:[#allocation20_spill] sm:$0xff] }
 0x18d   : > { %v1022_v32 = vadd.f32 %v2459_v55, %v1002_v41  ;;  %v1118_v39 = vmax.f32 %v1023_v61, 0.0  ;;  %v1012_v13 = vmul.f32 %v2449_v56, %v2833_v44  ;;  %v1119_v27 = vmax.f32 %v1024_v29, 0.0  ;;  %v2845_v29 = vld [vmem:[#allocation24_spill] sm:$0xff] }
 0x18e   : > { %v1131_v7 = vsel %vm1128_vm3, %v1116_v12, -inf  ;;  %v1029_v30 = vadd.f32 %v2459_v55, %v1009_v25  ;;  %v1030_v62 = vadd.f32 %v2459_v55, %v1010_v14  ;;  %v1031_v60 = vadd.f32 %v2459_v55, %v1011_v59  ;;  %v2844_v14 = vld [vmem:[#allocation23_spill] sm:$0xff] }
 0x18f   : > { %v1117_v36 = vmax.f32 %v1022_v32, 0.0  ;;  %v1132_v48 = vsel %vm1128_vm3, %v1118_v39, -inf  ;;  %v1135_v17 = vsel %vm1128_vm3, %v1119_v27, -inf  ;;  %v1032_v24 = vadd.f32 %v2459_v55, %v1012_v13  ;;  %v2847_v39 = vld [vmem:[#allocation27_spill] sm:$0xff] }
 0x190   : > { %v1133_v57 = vmax.f32 %v1131_v7, %v1132_v48  ;;  %v1124_v15 = vmax.f32 %v1029_v30, 0.0  ;;  %v1125_v10 = vmax.f32 %v1030_v62, 0.0  ;;  %v1126_v18 = vmax.f32 %v1031_v60, 0.0  ;;  %v2850_v48 = vld [vmem:[#allocation39_spill] sm:$0xff]  ;;  %v2851_v30 = vld [vmem:[#allocation40_spill] sm:$0xff] }
 0x191   : > { %v1134_v38 = vsel %vm1128_vm3, %v1117_v36, -inf  ;;  %v1127_v23 = vmax.f32 %v1032_v24, 0.0  ;;  %v2836_v26 = vmax.f32 %v2834_v49, %v2835_v6  ;;  %v2839_v51 = vmax.f32 %v2837_v54, %v2838_v42  ;;  %v2860_v49 = vld [vmem:[#allocation36_spill] sm:$0xff] }
 0x192   : > { %v1136_v20 = vmax.f32 %v1134_v38, %v1135_v17  ;;  %v2537_v34 = vsel %vm1128_vm3, %v1124_v15, -inf  ;;  %v2540_v4 = vsel %vm1128_vm3, %v1126_v18, -inf  ;;  %v2543_v1 = vsel %vm1128_vm3, %v1125_v10, -inf  ;;  %v2853_v17 = vld [vmem:[#allocation25_spill] sm:$0xff]  ;;  %v2854_v38 = vld [vmem:[#allocation26_spill] sm:$0xff] }
 0x193   : > { %v1145_v45 = vmax.f32 %v2537_v34, %v2540_v4  ;;  %v1147_v63 = vsel %vm1128_vm3, %v1127_v23, -inf  ;;  %v2841_v16 = vmax.f32 %v2840_v2, %v2819_v52  ;;  %v2843_v37 = vmax.f32 %v2842_v47, %v2824_v53 }
 0x194   : > { %v1148_v21 = vmax.f32 %v2543_v1, %v1147_v63  ;;  %v2846_v12 = vmax.f32 %v2844_v14, %v2845_v29  ;;  %v2849_v19 = vmax.f32 %v2847_v39, %v2848_v35  ;;  %v2852_v62 = vmax.f32 %v2850_v48, %v2851_v30  ;;  %v2856_v1 = vld [vmem:[#allocation45_spill] sm:$0xff]  ;;  %v2857_v63 = vld [vmem:[#allocation46_spill] sm:$0xff] }
 0x195   : > { %v999_v22 = vmul.f32 %v2449_v56, %v2841_v16  ;;  %v1000_v41 = vmul.f32 %v2449_v56, %v2843_v37  ;;  %v2855_v24 = vmax.f32 %v2853_v17, %v2854_v38 }
 0x197   : > { %v1020_v52 = vadd.f32 %v2459_v55, %v1000_v41 }
 0x199   : > { %v1115_v3 = vmax.f32 %v1020_v52, 0.0 }
 0x19b   : > { %v1130_v46 = vsel %vm1128_vm3, %v1115_v3, -inf }
 0x1d7   : > { %v1551_v9 = vpop.permute.xlu2 %1550 }
 0x1d8   : > { %v1553_v40 = vunpack.i.h.bf16 %v1551_v9  ;;  %v1552_v5 = vunpack.i.l.bf16 %v1551_v9  ;;  %v2858_v9 = vmax.f32 %v2856_v1, %v2857_v63 }
 0x1da   : > { %v1186_v28 = vsel %vm1049_vm1, %v2836_v26, %v1553_v40  ;;  %v1185_v0 = vsel %vm1049_vm1, %v2839_v51, %v1552_v5  ;;  %v2859_v5 = vld [vmem:[#allocation30_spill] sm:$0xff] }
 0x1db   : > { %v1193_v8 = vsel %vm437_vm0, %v1185_v0, %v1139_v43  ;;  %v1194_v58 = vsel %vm437_vm0, %v1186_v28, %v1142_v11  ;;  %v1019_v43 = vadd.f32 %v2459_v55, %v999_v22  ;;  %v2861_v6 = vmax.f32 %v2859_v5, %v2860_v49 }
 0x1dc   : > { %v1201_v61 = vpack.c.bf16 %v1193_v8, %v1193_v8  ;;  %v1202_v50 = vpack.c.bf16 %v1194_v58, %v1194_v58 }
 0x1dd   : > { %v1114_v11 = vmax.f32 %v1019_v43, 0.0 }
 0x1de   : > { %1210 = vst.msk [vmem:[%s2568_s30 + $0x10] sm:$0xf] %vm1205_vm4, %v1201_v61 }
 0x1df   : > { %1211 = vst.msk [vmem:[%s2568_s30 + $0x14] sm:$0xf] %vm1205_vm4, %v1202_v50  ;;  %v1129_v33 = vsel %vm1128_vm3, %v1114_v11, -inf }
 0x1e6   : > { %v1541_v53 = vpop.permute.xlu0 %1540 }
 0x1e7   : > { %v1543_v56 = vunpack.i.h.bf16 %v1541_v53  ;;  %v1542_v25 = vunpack.i.l.bf16 %v1541_v53 }
 0x1e9   : > { %v1181_v32 = vsel %vm1049_vm1, %v2846_v12, %v1542_v25  ;;  %v1182_v55 = vsel %vm1049_vm1, %v2849_v19, %v1543_v56 }
 0x1ea   : > { %v1189_v59 = vsel %vm437_vm0, %v1181_v32, %v1129_v33  ;;  %v1190_v31 = vsel %vm437_vm0, %v1182_v55, %v1130_v46  ;;  %v1546_v27 = vpop.permute.xlu1 %1545 }
 0x1eb   : > { %v1197_v44 = vpack.c.bf16 %v1189_v59, %v1189_v59  ;;  %v1198_v13 = vpack.c.bf16 %v1190_v31, %v1190_v31  ;;  %v1548_v7 = vunpack.i.h.bf16 %v1546_v27  ;;  %v1547_v36 = vunpack.i.l.bf16 %v1546_v27 }
 0x1ed   : > { %1206 = vst.msk [vmem:[%s2568_s30] sm:$0xf] %vm1205_vm4, %v1197_v44  ;;  %v1184_v60 = vsel %vm1049_vm1, %v2852_v62, %v1548_v7  ;;  %v1183_v15 = vsel %vm1049_vm1, %v2855_v24, %v1547_v36 }
 0x1ee   : > { %1207 = vst.msk [vmem:[%s2568_s30 + $0x4] sm:$0xf] %vm1205_vm4, %v1198_v13  ;;  %v1191_v10 = vsel %vm437_vm0, %v1183_v15, %v1133_v57  ;;  %v1192_v18 = vsel %vm437_vm0, %v1184_v60, %v1136_v20 }
 0x1ef   : > { %v1199_v23 = vpack.c.bf16 %v1191_v10, %v1191_v10  ;;  %v1200_v34 = vpack.c.bf16 %v1192_v18, %v1192_v18 }
 0x1f1   : > { %1208 = vst.msk [vmem:[%s2568_s30 + $0x8] sm:$0xf] %vm1205_vm4, %v1199_v23 }
 0x1f2   : > { %1209 = vst.msk [vmem:[%s2568_s30 + $0xc] sm:$0xf] %vm1205_vm4, %v1200_v34 }
 0x1fc   : > { %v1556_v4 = vpop.permute.xlu0 %1555 }
 0x1fd   : > { %v1558_v57 = vunpack.i.h.bf16 %v1556_v4  ;;  %v1557_v20 = vunpack.i.l.bf16 %v1556_v4 }
 0x1ff   : > { %v1188_v40 = vsel %vm1049_vm1, %v2858_v9, %v1558_v57  ;;  %v1187_v26 = vsel %vm1049_vm1, %v2861_v6, %v1557_v20 }
 0x200   : > { %v1195_v28 = vsel %vm437_vm0, %v1187_v26, %v1145_v45  ;;  %v1196_v54 = vsel %vm437_vm0, %v1188_v40, %v1148_v21 }
 0x201   : > { %v1203_v42 = vpack.c.bf16 %v1195_v28, %v1195_v28  ;;  %v1204_v51 = vpack.c.bf16 %v1196_v54, %v1196_v54 }
 0x203   : > { %1212 = vst.msk [vmem:[%s2568_s30 + $0x18] sm:$0xf] %vm1205_vm4, %v1203_v42 }
 0x204   : > { %1213 = vst.msk [vmem:[%s2568_s30 + $0x1c] sm:$0xf] %vm1205_vm4, %v1204_v51 }
 0x205   : > { %1620 = shalt.err (!%p1617_p13)
}
 0x206   : > { %s1699_s7 = smov 64  }
 0x207   : > { %1456 = dma.vmem_to_hbm [thread:$0]  (%p1800_p9), %s1230_s16, 512, %s1232_s24, %s1215_s25, %s1699_s7, %s1699_s7, %s1698_s21  }
 0x208 PF: > { %s2862_s30 = sld [smem:[#allocation9_spill]]  ;;  %p1467_p0 = scmp.ge.s32.totalorder %s1691_s28, 2 }
 0x20a   : > { %p1463_p1 = pnand %p1467_p0, %p1806_p12 }
 0x20c   : > { %p1464_p2 = pneg %p1463_p1 }
 0x20e   : > { %s1246_s15 = sand.u32 1, %s2862_s30  }
 0x20f   : > { %s1247_s9 = scalar_lea.sflag [#allocation5], %s1246_s15 }
 0x210   : > { %1658 = dma.done.wait (%p1464_p2), %s1247_s9, 512  }
 0x211   : > { %1660 = vsyncadd (%p1464_p2), %s1247_s9, 4294966784  ;;  %s22_s28 = sadd.s32 1, %s1691_s28   ;;  %s2864_s8 = sld [smem:[#allocation10_spill]] }
 0x212   : > { %p19_p4 = scmp.ge.s32.totalorder %s22_s28, 6   ;;  %s2865_s23 = sld [smem:[#allocation14_spill]] }
 0x213   : > { %s2866_s13 = sld [smem:[#allocation11_spill]]  ;;  %s2868_s21 = smov %s1667_s22 }
 0x214   : > { %s2867_s11 = sld [smem:[#allocation12_spill]]  ;;  %s2870_s24 = smov %s1683_s26 }
 0x215   : > { %s2871_s25 = smov %s1687_s27 }
 0x216   :  { %21 = sbr.rel (!%p19_p4) target bundleno = 7 (0x7), region = 111 }
 0x217   : > { %s2869_s22 = smov %s2864_s8 }
 0x219   : > { %s2872_s26 = smov %s2866_s13 }
 0x21a   : > { %s2873_s27 = smov %s2867_s11 }
 0x21b   :  { %1253 = vsyncpa [#allocation4], 1 }
 0x21c   :  { %1255 = vsyncpa [#allocation4 + $0x1], 1 }
 0x21d   :  { %1256 = vsyncpa [#allocation5], 1 }
 0x21e   :  { %1258 = vsyncpa [#allocation5 + $0x1], 1 }

</bundles_post_ra>
